<compile_context>
chip_gen: v7x
topology: tpu7x:2x2x1
jax: 0.10.0
libtpu: 0.0.40
codegen_flags: <defaults>
</compile_context>

<pallas_src>
import functools

import jax
import jax.numpy as jnp
import numpy as np
from jax.experimental import pallas as pl
from jax.experimental.pallas import tpu as pltpu


# ------------------------------ Pallas kernel ------------------------------ #

def _lenet5_kernel(x_ref, w1k_ref, b1_ref, p1_ref, q1_ref,
                   w2k_ref, b2_ref, p2_ref, q2_ref,
                   w3k_ref, b3_ref, w4_ref, b4_ref, w5_ref, b5_ref,
                   logits_ref, probs_ref, *, n_classes):
    f32 = jnp.float32
    x = x_ref[0]                                                  # (32, 32)

    # conv1 (1->6, 5x5) + bias + tanh  ->  (28, 28*6), lanes = (ow, cout)
    a = jnp.dot(x[0:28, :], w1k_ref[0], preferred_element_type=f32)
    for ki in range(1, 5):
        a = a + jnp.dot(x[ki:ki + 28, :], w1k_ref[ki],
                        preferred_element_type=f32)
    a = jnp.tanh(a + b1_ref[...])

    # AvgPool2d(2): row-pool (left matmul) then width/channel-pool (right)
    a = jnp.dot(p1_ref[...], a, preferred_element_type=f32)      # (14, 168)
    a = jnp.dot(a, q1_ref[...], preferred_element_type=f32)      # (14, 84)

    # conv2 (6->16, 5x5) + bias + tanh  ->  (10, 10*16)
    c = jnp.dot(a[0:10, :], w2k_ref[0], preferred_element_type=f32)
    for ki in range(1, 5):
        c = c + jnp.dot(a[ki:ki + 10, :], w2k_ref[ki],
                        preferred_element_type=f32)
    c = jnp.tanh(c + b2_ref[...])

    # AvgPool2d(2)  ->  (5, 5*16)
    c = jnp.dot(p2_ref[...], c, preferred_element_type=f32)      # (5, 160)
    c = jnp.dot(c, q2_ref[...], preferred_element_type=f32)      # (5, 80)

    # conv3 (16->120, 5x5) + bias + tanh -> (1, 120); 1x1 spatial == flatten
    f = jnp.dot(c[0:1, :], w3k_ref[0], preferred_element_type=f32)
    for ki in range(1, 5):
        f = f + jnp.dot(c[ki:ki + 1, :], w3k_ref[ki],
                        preferred_element_type=f32)
    f = jnp.tanh(f + b3_ref[...])

    # fc1 (120->84) + tanh
    f = jnp.tanh(jnp.dot(f, w4_ref[...], preferred_element_type=f32)
                 + b4_ref[...])                                   # (1, 84)

    # fc2 (84->n_classes, padded to 128 lanes) + masked softmax
    logits = jnp.dot(f, w5_ref[...], preferred_element_type=f32) + b5_ref[...]
    lane = jax.lax.broadcasted_iota(jnp.int32, logits.shape, 1)
    valid = lane < n_classes
    masked = jnp.where(valid, logits, -1e30)
    m = jnp.max(masked, axis=-1, keepdims=True)
    e = jnp.exp(masked - m)
    probs = e / jnp.sum(e, axis=-1, keepdims=True)

    logits_ref[0] = jnp.where(valid, logits, 0.0)                 # (1, 128)
    probs_ref[0] = probs                                          # (1, 128)


# ------------------------------ Forward wrapper ----------------------------- #

def lenet5_forward(x_nchw, params, n_classes=10):
    """x_nchw: (B, 1, 32, 32) float32.  Returns (logits, probs) of (B, n_classes)."""
    B, C, H, W = x_nchw.shape
    if (C, H, W) != (1, 32, 32):
        raise ValueError("LeNet-5 requires input of shape (B, 1, 32, 32)")
    if n_classes > 128:
        raise ValueError("n_classes must be <= 128")
    x = x_nchw.reshape(B, 32, 32).astype(jnp.float32)

    names = ("w1k", "b1t", "p1", "q1", "w2k", "b2t", "p2", "q2",
             "w3k", "b3", "w4", "b4", "w5", "b5")
    weights = [params[n] for n in names]

    def const_spec(arr):
        nd = arr.ndim
        return pl.BlockSpec(arr.shape, lambda b, nd=nd: (0,) * nd)

    in_specs = [pl.BlockSpec((1, 32, 32), lambda b: (b, 0, 0))]
    in_specs += [const_spec(a) for a in weights]
    out_spec = pl.BlockSpec((1, 1, 128), lambda b: (b, 0, 0))

    kernel = functools.partial(_lenet5_kernel, n_classes=n_classes)

    logits_p, probs_p = pl.pallas_call(
        kernel,
        out_shape=(jax.ShapeDtypeStruct((B, 1, 128), jnp.float32),
                   jax.ShapeDtypeStruct((B, 1, 128), jnp.float32)),
        grid=(B,),
        in_specs=in_specs,
        out_specs=(out_spec, out_spec),
        compiler_params=pltpu.CompilerParams(
            dimension_semantics=("parallel",)),
    )(x, *weights)

    return logits_p[:, 0, :n_classes], probs_p[:, 0, :n_classes]


# -------------------------- Parameter init / packing ------------------------ #

def init_raw_params(key, n_classes=10):
    """Raw PyTorch-layout weights with PyTorch default (uniform) init."""
    ks = jax.random.split(key, 10)

    def u(k, shape, fan_in):
        bound = 1.0 / float(fan_in) ** 0.5
        return jax.random.uniform(k, shape, jnp.float32, -bound, bound)

    return dict(
        w1=u(ks[0], (6, 1, 5, 5), 25),     b1=u(ks[1], (6,), 25),
        w2=u(ks[2], (16, 6, 5, 5), 150),   b2=u(ks[3], (16,), 150),
        w3=u(ks[4], (120, 16, 5, 5), 400), b3=u(ks[5], (120,), 400),
        w4=u(ks[6], (84, 120), 120),       b4=u(ks[7], (84,), 120),
        w5=u(ks[8], (n_classes, 84), 84),  b5=u(ks[9], (n_classes,), 84),
    )


def pack_params(raw, n_classes=10):
    """Pack raw weights into the kernel's banded / pooled / padded layout."""
    w1 = np.asarray(raw["w1"], np.float32); b1 = np.asarray(raw["b1"], np.float32)
    w2 = np.asarray(raw["w2"], np.float32); b2 = np.asarray(raw["b2"], np.float32)
    w3 = np.asarray(raw["w3"], np.float32); b3 = np.asarray(raw["b3"], np.float32)
    w4 = np.asarray(raw["w4"], np.float32); b4 = np.asarray(raw["b4"], np.float32)
    w5 = np.asarray(raw["w5"], np.float32); b5 = np.asarray(raw["b5"], np.float32)

    # conv1: per-kernel-row banded matrices (W_in, OW*Cout).
    # w1k[ki, ow+kj, ow*6+co] = w1[co, 0, ki, kj]
    w1k = np.zeros((5, 32, 28 * 6), np.float32)
    for ki in range(5):
        for kj in range(5):
            for ow in range(28):
                w1k[ki, ow + kj, ow * 6:(ow + 1) * 6] = w1[:, 0, ki, kj]

    # conv2: input lanes = (ow_in, cin=6), output lanes = (ow_out, cout=16).
    w2k = np.zeros((5, 14 * 6, 10 * 16), np.float32)
    for ki in range(5):
        for kj in range(5):
            for ow in range(10):
                w2k[ki, (ow + kj) * 6:(ow + kj + 1) * 6,
                    ow * 16:(ow + 1) * 16] = w2[:, :, ki, kj].T

    # conv3: input lanes = (kj, cin=16), output lanes = cout=120.
    w3k = np.zeros((5, 5 * 16, 120), np.float32)
    for ki in range(5):
        for kj in range(5):
            w3k[ki, kj * 16:(kj + 1) * 16, :] = w3[:, :, ki, kj].T

    def pool_mats(h, w, c):
        # left (rows) and right (width*channels) 2x2 average-pool matrices;
        # 0.5 * 0.5 = 0.25 per window element.
        p = np.zeros((h // 2, h), np.float32)
        for i in range(h // 2):
            p[i, 2 * i] = 0.5
            p[i, 2 * i + 1] = 0.5
        q = np.zeros((w * c, (w // 2) * c), np.float32)
        eye = 0.5 * np.eye(c, dtype=np.float32)
        for j in range(w // 2):
            for d in range(2):
                q[(2 * j + d) * c:(2 * j + d + 1) * c, j * c:(j + 1) * c] = eye
        return p, q

    p1, q1 = pool_mats(28, 28, 6)
    p2, q2 = pool_mats(10, 10, 16)

    w5p = np.zeros((84, 128), np.float32)
    w5p[:, :n_classes] = w5.T
    b5p = np.zeros((1, 128), np.float32)
    b5p[0, :n_classes] = b5

    return dict(
        w1k=jnp.asarray(w1k), b1t=jnp.asarray(np.tile(b1, 28).reshape(1, -1)),
        p1=jnp.asarray(p1), q1=jnp.asarray(q1),
        w2k=jnp.asarray(w2k), b2t=jnp.asarray(np.tile(b2, 10).reshape(1, -1)),
        p2=jnp.asarray(p2), q2=jnp.asarray(q2),
        w3k=jnp.asarray(w3k), b3=jnp.asarray(b3.reshape(1, -1)),
        w4=jnp.asarray(np.ascontiguousarray(w4.T)),
        b4=jnp.asarray(b4.reshape(1, -1)),
        w5=jnp.asarray(w5p), b5=jnp.asarray(b5p),
    )


# --------------------------- Pure-JAX reference ----------------------------- #

def lenet5_reference(x_nchw, raw):
    x = x_nchw.astype(jnp.float32)

    def conv(v, w, b):
        y = jax.lax.conv_general_dilated(
            v, w, window_strides=(1, 1), padding="VALID",
            dimension_numbers=("NCHW", "OIHW", "NCHW"))
        return y + b.reshape(1, -1, 1, 1)

    def pool(v):
        n, ch, h, w = v.shape
        return v.reshape(n, ch, h // 2, 2, w // 2, 2).mean(axis=(3, 5))

    y = pool(jnp.tanh(conv(x, raw["w1"], raw["b1"])))
    y = pool(jnp.tanh(conv(y, raw["w2"], raw["b2"])))
    y = jnp.tanh(conv(y, raw["w3"], raw["b3"]))
    y = y.reshape(y.shape[0], -1)
    y = jnp.tanh(y @ raw["w4"].T + raw["b4"])
    logits = y @ raw["w5"].T + raw["b5"]
    return logits, jax.nn.softmax(logits, axis=-1)


# ----------------------------------- main ----------------------------------- #

if __name__ == "__main__":
    n_classes = 10
    key = jax.random.PRNGKey(0)
    k_x, k_p = jax.random.split(key)

    # LeNet-5 requires 32x32 single-channel input for the architecture to close.
    x = jax.random.normal(k_x, (2, 1, 32, 32), dtype=jnp.float32)
    raw = init_raw_params(k_p, n_classes=n_classes)
    params = pack_params(raw, n_classes=n_classes)

    fwd = jax.jit(lenet5_forward, static_argnames=("n_classes",))
    logits, probs = fwd(x, params, n_classes=n_classes)
    jax.block_until_ready((logits, probs))

    assert logits.shape == (2, n_classes) and probs.shape == (2, n_classes)

    # Correctness check against a plain-JAX/XLA implementation of the module.
    ref_logits, ref_probs = jax.jit(lenet5_reference)(x, raw)
    assert float(jnp.max(jnp.abs(logits - ref_logits))) < 5e-2
    assert float(jnp.max(jnp.abs(probs - ref_probs))) < 5e-2
    assert float(jnp.max(jnp.abs(jnp.sum(probs, axis=-1) - 1.0))) < 1e-3

    print("KERNEL_OK")
</pallas_src>

<mosaic_0001>
module attributes {stable_mosaic.version = 11 : i64} {
  func.func @_lenet5_kernel(%arg0: i32, %arg1: memref<1x32x32xf32, #tpu.memory_space<vmem>>, %arg2: memref<5x32x168xf32, #tpu.memory_space<vmem>>, %arg3: memref<1x168xf32, #tpu.memory_space<vmem>>, %arg4: memref<14x28xf32, #tpu.memory_space<vmem>>, %arg5: memref<168x84xf32, #tpu.memory_space<vmem>>, %arg6: memref<5x84x160xf32, #tpu.memory_space<vmem>>, %arg7: memref<1x160xf32, #tpu.memory_space<vmem>>, %arg8: memref<5x10xf32, #tpu.memory_space<vmem>>, %arg9: memref<160x80xf32, #tpu.memory_space<vmem>>, %arg10: memref<5x80x120xf32, #tpu.memory_space<vmem>>, %arg11: memref<1x120xf32, #tpu.memory_space<vmem>>, %arg12: memref<120x84xf32, #tpu.memory_space<vmem>>, %arg13: memref<1x84xf32, #tpu.memory_space<vmem>>, %arg14: memref<84x128xf32, #tpu.memory_space<vmem>>, %arg15: memref<1x128xf32, #tpu.memory_space<vmem>>, %arg16: memref<1x1x128xf32, #tpu.memory_space<vmem>>, %arg17: memref<1x1x128xf32, #tpu.memory_space<vmem>>) attributes {dimension_semantics = [#tpu.dimension_semantics<parallel>], iteration_bounds = array<i64: 2>, scalar_prefetch = 0 : i64, scratch_operands = 0 : i64, tpu.core_type = #tpu.core_type<tc>, window_params = [{transform_indices = @transform_0, window_bounds = array<i64: 1, 32, 32>}, {pipeline_mode = #tpu.pipeline_mode<synchronous>, transform_indices = @transform_1, window_bounds = array<i64: 5, 32, 168>}, {pipeline_mode = #tpu.pipeline_mode<synchronous>, transform_indices = @transform_2, window_bounds = array<i64: 1, 168>}, {pipeline_mode = #tpu.pipeline_mode<synchronous>, transform_indices = @transform_3, window_bounds = array<i64: 14, 28>}, {pipeline_mode = #tpu.pipeline_mode<synchronous>, transform_indices = @transform_4, window_bounds = array<i64: 168, 84>}, {pipeline_mode = #tpu.pipeline_mode<synchronous>, transform_indices = @transform_5, window_bounds = array<i64: 5, 84, 160>}, {pipeline_mode = #tpu.pipeline_mode<synchronous>, transform_indices = @transform_6, window_bounds = array<i64: 1, 160>}, {pipeline_mode = #tpu.pipeline_mode<synchronous>, transform_indices = @transform_7, window_bounds = array<i64: 5, 10>}, {pipeline_mode = #tpu.pipeline_mode<synchronous>, transform_indices = @transform_8, window_bounds = array<i64: 160, 80>}, {pipeline_mode = #tpu.pipeline_mode<synchronous>, transform_indices = @transform_9, window_bounds = array<i64: 5, 80, 120>}, {pipeline_mode = #tpu.pipeline_mode<synchronous>, transform_indices = @transform_10, window_bounds = array<i64: 1, 120>}, {pipeline_mode = #tpu.pipeline_mode<synchronous>, transform_indices = @transform_11, window_bounds = array<i64: 120, 84>}, {pipeline_mode = #tpu.pipeline_mode<synchronous>, transform_indices = @transform_12, window_bounds = array<i64: 1, 84>}, {pipeline_mode = #tpu.pipeline_mode<synchronous>, transform_indices = @transform_13, window_bounds = array<i64: 84, 128>}, {pipeline_mode = #tpu.pipeline_mode<synchronous>, transform_indices = @transform_14, window_bounds = array<i64: 1, 128>}, {transform_indices = @transform_15, window_bounds = array<i64: 1, 1, 128>}, {transform_indices = @transform_16, window_bounds = array<i64: 1, 1, 128>}]} {
    %c0 = arith.constant 0 : index
    %c0_0 = arith.constant 0 : index
    %c0_1 = arith.constant 0 : index
    %0 = vector.load %arg1[%c0, %c0_0, %c0_1] : memref<1x32x32xf32, #tpu.memory_space<vmem>>, vector<1x32x32xf32>
    %1 = vector.shape_cast %0 : vector<1x32x32xf32> to vector<32x32xf32>
    %2 = vector.extract_strided_slice %1 {offsets = [0, 0], sizes = [28, 32], strides = [1, 1]} : vector<32x32xf32> to vector<28x32xf32>
    %c0_2 = arith.constant 0 : index
    %c0_3 = arith.constant 0 : index
    %c0_4 = arith.constant 0 : index
    %3 = vector.load %arg2[%c0_2, %c0_3, %c0_4] : memref<5x32x168xf32, #tpu.memory_space<vmem>>, vector<1x32x168xf32>
    %4 = vector.shape_cast %3 : vector<1x32x168xf32> to vector<32x168xf32>
    %cst = arith.constant dense<0.000000e+00> : vector<28x168xf32>
    %5 = tpu.matmul %2, %4, %cst {dimension_numbers = #tpu.dot_dimension_numbers<[1], [0], [0], [1], [0, 0, 1, 1], [], []>} : vector<28x32xf32>, vector<32x168xf32>, vector<28x168xf32> -> vector<28x168xf32>
    %6 = vector.extract_strided_slice %1 {offsets = [1, 0], sizes = [28, 32], strides = [1, 1]} : vector<32x32xf32> to vector<28x32xf32>
    %c1 = arith.constant 1 : index
    %c0_5 = arith.constant 0 : index
    %c0_6 = arith.constant 0 : index
    %7 = vector.load %arg2[%c1, %c0_5, %c0_6] : memref<5x32x168xf32, #tpu.memory_space<vmem>>, vector<1x32x168xf32>
    %8 = vector.shape_cast %7 : vector<1x32x168xf32> to vector<32x168xf32>
    %cst_7 = arith.constant dense<0.000000e+00> : vector<28x168xf32>
    %9 = tpu.matmul %6, %8, %cst_7 {dimension_numbers = #tpu.dot_dimension_numbers<[1], [0], [0], [1], [0, 0, 1, 1], [], []>} : vector<28x32xf32>, vector<32x168xf32>, vector<28x168xf32> -> vector<28x168xf32>
    %10 = arith.addf %5, %9 : vector<28x168xf32>
    %11 = vector.extract_strided_slice %1 {offsets = [2, 0], sizes = [28, 32], strides = [1, 1]} : vector<32x32xf32> to vector<28x32xf32>
    %c2 = arith.constant 2 : index
    %c0_8 = arith.constant 0 : index
    %c0_9 = arith.constant 0 : index
    %12 = vector.load %arg2[%c2, %c0_8, %c0_9] : memref<5x32x168xf32, #tpu.memory_space<vmem>>, vector<1x32x168xf32>
    %13 = vector.shape_cast %12 : vector<1x32x168xf32> to vector<32x168xf32>
    %cst_10 = arith.constant dense<0.000000e+00> : vector<28x168xf32>
    %14 = tpu.matmul %11, %13, %cst_10 {dimension_numbers = #tpu.dot_dimension_numbers<[1], [0], [0], [1], [0, 0, 1, 1], [], []>} : vector<28x32xf32>, vector<32x168xf32>, vector<28x168xf32> -> vector<28x168xf32>
    %15 = arith.addf %10, %14 : vector<28x168xf32>
    %16 = vector.extract_strided_slice %1 {offsets = [3, 0], sizes = [28, 32], strides = [1, 1]} : vector<32x32xf32> to vector<28x32xf32>
    %c3 = arith.constant 3 : index
    %c0_11 = arith.constant 0 : index
    %c0_12 = arith.constant 0 : index
    %17 = vector.load %arg2[%c3, %c0_11, %c0_12] : memref<5x32x168xf32, #tpu.memory_space<vmem>>, vector<1x32x168xf32>
    %18 = vector.shape_cast %17 : vector<1x32x168xf32> to vector<32x168xf32>
    %cst_13 = arith.constant dense<0.000000e+00> : vector<28x168xf32>
    %19 = tpu.matmul %16, %18, %cst_13 {dimension_numbers = #tpu.dot_dimension_numbers<[1], [0], [0], [1], [0, 0, 1, 1], [], []>} : vector<28x32xf32>, vector<32x168xf32>, vector<28x168xf32> -> vector<28x168xf32>
    %20 = arith.addf %15, %19 : vector<28x168xf32>
    %21 = vector.extract_strided_slice %1 {offsets = [4, 0], sizes = [28, 32], strides = [1, 1]} : vector<32x32xf32> to vector<28x32xf32>
    %c4 = arith.constant 4 : index
    %c0_14 = arith.constant 0 : index
    %c0_15 = arith.constant 0 : index
    %22 = vector.load %arg2[%c4, %c0_14, %c0_15] : memref<5x32x168xf32, #tpu.memory_space<vmem>>, vector<1x32x168xf32>
    %23 = vector.shape_cast %22 : vector<1x32x168xf32> to vector<32x168xf32>
    %cst_16 = arith.constant dense<0.000000e+00> : vector<28x168xf32>
    %24 = tpu.matmul %21, %23, %cst_16 {dimension_numbers = #tpu.dot_dimension_numbers<[1], [0], [0], [1], [0, 0, 1, 1], [], []>} : vector<28x32xf32>, vector<32x168xf32>, vector<28x168xf32> -> vector<28x168xf32>
    %25 = arith.addf %20, %24 : vector<28x168xf32>
    %c0_17 = arith.constant 0 : index
    %c0_18 = arith.constant 0 : index
    %26 = vector.load %arg3[%c0_17, %c0_18] : memref<1x168xf32, #tpu.memory_space<vmem>>, vector<1x168xf32>
    %27 = vector.broadcast %26 : vector<1x168xf32> to vector<28x168xf32>
    %28 = arith.addf %25, %27 : vector<28x168xf32>
    %29 = math.tanh %28 : vector<28x168xf32>
    %c0_19 = arith.constant 0 : index
    %c0_20 = arith.constant 0 : index
    %30 = vector.load %arg4[%c0_19, %c0_20] : memref<14x28xf32, #tpu.memory_space<vmem>>, vector<14x28xf32>
    %cst_21 = arith.constant dense<0.000000e+00> : vector<14x168xf32>
    %31 = tpu.matmul %30, %29, %cst_21 {dimension_numbers = #tpu.dot_dimension_numbers<[1], [0], [0], [1], [0, 0, 1, 1], [], []>} : vector<14x28xf32>, vector<28x168xf32>, vector<14x168xf32> -> vector<14x168xf32>
    %c0_22 = arith.constant 0 : index
    %c0_23 = arith.constant 0 : index
    %32 = vector.load %arg5[%c0_22, %c0_23] : memref<168x84xf32, #tpu.memory_space<vmem>>, vector<168x84xf32>
    %cst_24 = arith.constant dense<0.000000e+00> : vector<14x84xf32>
    %33 = tpu.matmul %31, %32, %cst_24 {dimension_numbers = #tpu.dot_dimension_numbers<[1], [0], [0], [1], [0, 0, 1, 1], [], []>} : vector<14x168xf32>, vector<168x84xf32>, vector<14x84xf32> -> vector<14x84xf32>
    %34 = vector.extract_strided_slice %33 {offsets = [0, 0], sizes = [10, 84], strides = [1, 1]} : vector<14x84xf32> to vector<10x84xf32>
    %c0_25 = arith.constant 0 : index
    %c0_26 = arith.constant 0 : index
    %c0_27 = arith.constant 0 : index
    %35 = vector.load %arg6[%c0_25, %c0_26, %c0_27] : memref<5x84x160xf32, #tpu.memory_space<vmem>>, vector<1x84x160xf32>
    %36 = vector.shape_cast %35 : vector<1x84x160xf32> to vector<84x160xf32>
    %cst_28 = arith.constant dense<0.000000e+00> : vector<10x160xf32>
    %37 = tpu.matmul %34, %36, %cst_28 {dimension_numbers = #tpu.dot_dimension_numbers<[1], [0], [0], [1], [0, 0, 1, 1], [], []>} : vector<10x84xf32>, vector<84x160xf32>, vector<10x160xf32> -> vector<10x160xf32>
    %38 = vector.extract_strided_slice %33 {offsets = [1, 0], sizes = [10, 84], strides = [1, 1]} : vector<14x84xf32> to vector<10x84xf32>
    %c1_29 = arith.constant 1 : index
    %c0_30 = arith.constant 0 : index
    %c0_31 = arith.constant 0 : index
    %39 = vector.load %arg6[%c1_29, %c0_30, %c0_31] : memref<5x84x160xf32, #tpu.memory_space<vmem>>, vector<1x84x160xf32>
    %40 = vector.shape_cast %39 : vector<1x84x160xf32> to vector<84x160xf32>
    %cst_32 = arith.constant dense<0.000000e+00> : vector<10x160xf32>
    %41 = tpu.matmul %38, %40, %cst_32 {dimension_numbers = #tpu.dot_dimension_numbers<[1], [0], [0], [1], [0, 0, 1, 1], [], []>} : vector<10x84xf32>, vector<84x160xf32>, vector<10x160xf32> -> vector<10x160xf32>
    %42 = arith.addf %37, %41 : vector<10x160xf32>
    %43 = vector.extract_strided_slice %33 {offsets = [2, 0], sizes = [10, 84], strides = [1, 1]} : vector<14x84xf32> to vector<10x84xf32>
    %c2_33 = arith.constant 2 : index
    %c0_34 = arith.constant 0 : index
    %c0_35 = arith.constant 0 : index
    %44 = vector.load %arg6[%c2_33, %c0_34, %c0_35] : memref<5x84x160xf32, #tpu.memory_space<vmem>>, vector<1x84x160xf32>
    %45 = vector.shape_cast %44 : vector<1x84x160xf32> to vector<84x160xf32>
    %cst_36 = arith.constant dense<0.000000e+00> : vector<10x160xf32>
    %46 = tpu.matmul %43, %45, %cst_36 {dimension_numbers = #tpu.dot_dimension_numbers<[1], [0], [0], [1], [0, 0, 1, 1], [], []>} : vector<10x84xf32>, vector<84x160xf32>, vector<10x160xf32> -> vector<10x160xf32>
    %47 = arith.addf %42, %46 : vector<10x160xf32>
    %48 = vector.extract_strided_slice %33 {offsets = [3, 0], sizes = [10, 84], strides = [1, 1]} : vector<14x84xf32> to vector<10x84xf32>
    %c3_37 = arith.constant 3 : index
    %c0_38 = arith.constant 0 : index
    %c0_39 = arith.constant 0 : index
    %49 = vector.load %arg6[%c3_37, %c0_38, %c0_39] : memref<5x84x160xf32, #tpu.memory_space<vmem>>, vector<1x84x160xf32>
    %50 = vector.shape_cast %49 : vector<1x84x160xf32> to vector<84x160xf32>
    %cst_40 = arith.constant dense<0.000000e+00> : vector<10x160xf32>
    %51 = tpu.matmul %48, %50, %cst_40 {dimension_numbers = #tpu.dot_dimension_numbers<[1], [0], [0], [1], [0, 0, 1, 1], [], []>} : vector<10x84xf32>, vector<84x160xf32>, vector<10x160xf32> -> vector<10x160xf32>
    %52 = arith.addf %47, %51 : vector<10x160xf32>
    %53 = vector.extract_strided_slice %33 {offsets = [4, 0], sizes = [10, 84], strides = [1, 1]} : vector<14x84xf32> to vector<10x84xf32>
    %c4_41 = arith.constant 4 : index
    %c0_42 = arith.constant 0 : index
    %c0_43 = arith.constant 0 : index
    %54 = vector.load %arg6[%c4_41, %c0_42, %c0_43] : memref<5x84x160xf32, #tpu.memory_space<vmem>>, vector<1x84x160xf32>
    %55 = vector.shape_cast %54 : vector<1x84x160xf32> to vector<84x160xf32>
    %cst_44 = arith.constant dense<0.000000e+00> : vector<10x160xf32>
    %56 = tpu.matmul %53, %55, %cst_44 {dimension_numbers = #tpu.dot_dimension_numbers<[1], [0], [0], [1], [0, 0, 1, 1], [], []>} : vector<10x84xf32>, vector<84x160xf32>, vector<10x160xf32> -> vector<10x160xf32>
    %57 = arith.addf %52, %56 : vector<10x160xf32>
    %c0_45 = arith.constant 0 : index
    %c0_46 = arith.constant 0 : index
    %58 = vector.load %arg7[%c0_45, %c0_46] : memref<1x160xf32, #tpu.memory_space<vmem>>, vector<1x160xf32>
    %59 = vector.broadcast %58 : vector<1x160xf32> to vector<10x160xf32>
    %60 = arith.addf %57, %59 : vector<10x160xf32>
    %61 = math.tanh %60 : vector<10x160xf32>
    %c0_47 = arith.constant 0 : index
    %c0_48 = arith.constant 0 : index
    %62 = vector.load %arg8[%c0_47, %c0_48] : memref<5x10xf32, #tpu.memory_space<vmem>>, vector<5x10xf32>
    %cst_49 = arith.constant dense<0.000000e+00> : vector<5x160xf32>
    %63 = tpu.matmul %62, %61, %cst_49 {dimension_numbers = #tpu.dot_dimension_numbers<[1], [0], [0], [1], [0, 0, 1, 1], [], []>} : vector<5x10xf32>, vector<10x160xf32>, vector<5x160xf32> -> vector<5x160xf32>
    %c0_50 = arith.constant 0 : index
    %c0_51 = arith.constant 0 : index
    %64 = vector.load %arg9[%c0_50, %c0_51] : memref<160x80xf32, #tpu.memory_space<vmem>>, vector<160x80xf32>
    %cst_52 = arith.constant dense<0.000000e+00> : vector<5x80xf32>
    %65 = tpu.matmul %63, %64, %cst_52 {dimension_numbers = #tpu.dot_dimension_numbers<[1], [0], [0], [1], [0, 0, 1, 1], [], []>} : vector<5x160xf32>, vector<160x80xf32>, vector<5x80xf32> -> vector<5x80xf32>
    %66 = vector.extract_strided_slice %65 {offsets = [0, 0], sizes = [1, 80], strides = [1, 1]} : vector<5x80xf32> to vector<1x80xf32>
    %c0_53 = arith.constant 0 : index
    %c0_54 = arith.constant 0 : index
    %c0_55 = arith.constant 0 : index
    %67 = vector.load %arg10[%c0_53, %c0_54, %c0_55] : memref<5x80x120xf32, #tpu.memory_space<vmem>>, vector<1x80x120xf32>
    %68 = vector.shape_cast %67 : vector<1x80x120xf32> to vector<80x120xf32>
    %cst_56 = arith.constant dense<0.000000e+00> : vector<1x120xf32>
    %69 = tpu.matmul %66, %68, %cst_56 {dimension_numbers = #tpu.dot_dimension_numbers<[1], [0], [0], [1], [0, 0, 1, 1], [], []>} : vector<1x80xf32>, vector<80x120xf32>, vector<1x120xf32> -> vector<1x120xf32>
    %70 = vector.extract_strided_slice %65 {offsets = [1, 0], sizes = [1, 80], strides = [1, 1]} : vector<5x80xf32> to vector<1x80xf32>
    %c1_57 = arith.constant 1 : index
    %c0_58 = arith.constant 0 : index
    %c0_59 = arith.constant 0 : index
    %71 = vector.load %arg10[%c1_57, %c0_58, %c0_59] : memref<5x80x120xf32, #tpu.memory_space<vmem>>, vector<1x80x120xf32>
    %72 = vector.shape_cast %71 : vector<1x80x120xf32> to vector<80x120xf32>
    %cst_60 = arith.constant dense<0.000000e+00> : vector<1x120xf32>
    %73 = tpu.matmul %70, %72, %cst_60 {dimension_numbers = #tpu.dot_dimension_numbers<[1], [0], [0], [1], [0, 0, 1, 1], [], []>} : vector<1x80xf32>, vector<80x120xf32>, vector<1x120xf32> -> vector<1x120xf32>
    %74 = arith.addf %69, %73 : vector<1x120xf32>
    %75 = vector.extract_strided_slice %65 {offsets = [2, 0], sizes = [1, 80], strides = [1, 1]} : vector<5x80xf32> to vector<1x80xf32>
    %c2_61 = arith.constant 2 : index
    %c0_62 = arith.constant 0 : index
    %c0_63 = arith.constant 0 : index
    %76 = vector.load %arg10[%c2_61, %c0_62, %c0_63] : memref<5x80x120xf32, #tpu.memory_space<vmem>>, vector<1x80x120xf32>
    %77 = vector.shape_cast %76 : vector<1x80x120xf32> to vector<80x120xf32>
    %cst_64 = arith.constant dense<0.000000e+00> : vector<1x120xf32>
    %78 = tpu.matmul %75, %77, %cst_64 {dimension_numbers = #tpu.dot_dimension_numbers<[1], [0], [0], [1], [0, 0, 1, 1], [], []>} : vector<1x80xf32>, vector<80x120xf32>, vector<1x120xf32> -> vector<1x120xf32>
    %79 = arith.addf %74, %78 : vector<1x120xf32>
    %80 = vector.extract_strided_slice %65 {offsets = [3, 0], sizes = [1, 80], strides = [1, 1]} : vector<5x80xf32> to vector<1x80xf32>
    %c3_65 = arith.constant 3 : index
    %c0_66 = arith.constant 0 : index
    %c0_67 = arith.constant 0 : index
    %81 = vector.load %arg10[%c3_65, %c0_66, %c0_67] : memref<5x80x120xf32, #tpu.memory_space<vmem>>, vector<1x80x120xf32>
    %82 = vector.shape_cast %81 : vector<1x80x120xf32> to vector<80x120xf32>
    %cst_68 = arith.constant dense<0.000000e+00> : vector<1x120xf32>
    %83 = tpu.matmul %80, %82, %cst_68 {dimension_numbers = #tpu.dot_dimension_numbers<[1], [0], [0], [1], [0, 0, 1, 1], [], []>} : vector<1x80xf32>, vector<80x120xf32>, vector<1x120xf32> -> vector<1x120xf32>
    %84 = arith.addf %79, %83 : vector<1x120xf32>
    %85 = vector.extract_strided_slice %65 {offsets = [4, 0], sizes = [1, 80], strides = [1, 1]} : vector<5x80xf32> to vector<1x80xf32>
    %c4_69 = arith.constant 4 : index
    %c0_70 = arith.constant 0 : index
    %c0_71 = arith.constant 0 : index
    %86 = vector.load %arg10[%c4_69, %c0_70, %c0_71] : memref<5x80x120xf32, #tpu.memory_space<vmem>>, vector<1x80x120xf32>
    %87 = vector.shape_cast %86 : vector<1x80x120xf32> to vector<80x120xf32>
    %cst_72 = arith.constant dense<0.000000e+00> : vector<1x120xf32>
    %88 = tpu.matmul %85, %87, %cst_72 {dimension_numbers = #tpu.dot_dimension_numbers<[1], [0], [0], [1], [0, 0, 1, 1], [], []>} : vector<1x80xf32>, vector<80x120xf32>, vector<1x120xf32> -> vector<1x120xf32>
    %89 = arith.addf %84, %88 : vector<1x120xf32>
    %c0_73 = arith.constant 0 : index
    %c0_74 = arith.constant 0 : index
    %90 = vector.load %arg11[%c0_73, %c0_74] : memref<1x120xf32, #tpu.memory_space<vmem>>, vector<1x120xf32>
    %91 = arith.addf %89, %90 : vector<1x120xf32>
    %92 = math.tanh %91 : vector<1x120xf32>
    %c0_75 = arith.constant 0 : index
    %c0_76 = arith.constant 0 : index
    %93 = vector.load %arg12[%c0_75, %c0_76] : memref<120x84xf32, #tpu.memory_space<vmem>>, vector<120x84xf32>
    %cst_77 = arith.constant dense<0.000000e+00> : vector<1x84xf32>
    %94 = tpu.matmul %92, %93, %cst_77 {dimension_numbers = #tpu.dot_dimension_numbers<[1], [0], [0], [1], [0, 0, 1, 1], [], []>} : vector<1x120xf32>, vector<120x84xf32>, vector<1x84xf32> -> vector<1x84xf32>
    %c0_78 = arith.constant 0 : index
    %c0_79 = arith.constant 0 : index
    %95 = vector.load %arg13[%c0_78, %c0_79] : memref<1x84xf32, #tpu.memory_space<vmem>>, vector<1x84xf32>
    %96 = arith.addf %94, %95 : vector<1x84xf32>
    %97 = math.tanh %96 : vector<1x84xf32>
    %c0_80 = arith.constant 0 : index
    %c0_81 = arith.constant 0 : index
    %98 = vector.load %arg14[%c0_80, %c0_81] : memref<84x128xf32, #tpu.memory_space<vmem>>, vector<84x128xf32>
    %cst_82 = arith.constant dense<0.000000e+00> : vector<1x128xf32>
    %99 = tpu.matmul %97, %98, %cst_82 {dimension_numbers = #tpu.dot_dimension_numbers<[1], [0], [0], [1], [0, 0, 1, 1], [], []>} : vector<1x84xf32>, vector<84x128xf32>, vector<1x128xf32> -> vector<1x128xf32>
    %c0_83 = arith.constant 0 : index
    %c0_84 = arith.constant 0 : index
    %100 = vector.load %arg15[%c0_83, %c0_84] : memref<1x128xf32, #tpu.memory_space<vmem>>, vector<1x128xf32>
    %101 = arith.addf %99, %100 : vector<1x128xf32>
    %102 = tpu.iota {dimensions = array<i32: 1>} : vector<1x128xi32>
    %c10_i32 = arith.constant 10 : i32
    %103 = vector.broadcast %c10_i32 : i32 to vector<1x128xi32>
    %104 = arith.cmpi slt, %102, %103 : vector<1x128xi32>
    %cst_85 = arith.constant -1.000000e+30 : f32
    %105 = vector.broadcast %cst_85 : f32 to vector<1x128xf32>
    %106 = arith.select %104, %101, %105 : vector<1x128xi1>, vector<1x128xf32>
    %cst_86 = arith.constant dense<0xFF800000> : vector<1xf32>
    %107 = vector.multi_reduction <maximumf>, %106, %cst_86 [1] : vector<1x128xf32> to vector<1xf32>
    %108 = vector.shape_cast %107 : vector<1xf32> to vector<1x1xf32>
    %109 = vector.broadcast %108 : vector<1x1xf32> to vector<1x128xf32>
    %110 = arith.subf %106, %109 : vector<1x128xf32>
    %111 = math.exp %110 : vector<1x128xf32>
    %cst_87 = arith.constant dense<0.000000e+00> : vector<1xf32>
    %112 = vector.multi_reduction <add>, %111, %cst_87 [1] : vector<1x128xf32> to vector<1xf32>
    %113 = vector.shape_cast %112 : vector<1xf32> to vector<1x1xf32>
    %114 = vector.broadcast %113 : vector<1x1xf32> to vector<1x128xf32>
    %115 = arith.divf %111, %114 : vector<1x128xf32>
    %cst_88 = arith.constant 0.000000e+00 : f32
    %116 = vector.broadcast %cst_88 : f32 to vector<1x128xf32>
    %117 = arith.select %104, %101, %116 : vector<1x128xi1>, vector<1x128xf32>
    %c0_89 = arith.constant 0 : index
    %c0_90 = arith.constant 0 : index
    %c0_91 = arith.constant 0 : index
    %118 = vector.load %arg16[%c0_89, %c0_90, %c0_91] : memref<1x1x128xf32, #tpu.memory_space<vmem>>, vector<1x1x128xf32>
    %119 = vector.shape_cast %118 : vector<1x1x128xf32> to vector<1x128xf32>
    %120 = vector.shape_cast %117 : vector<1x128xf32> to vector<1x1x128xf32>
    tpu.vector_store %arg16[%c0_89, %c0_90, %c0_91], %120 {strides = array<i32>} : memref<1x1x128xf32, #tpu.memory_space<vmem>>, vector<1x1x128xf32>,
    %c0_92 = arith.constant 0 : index
    %c0_93 = arith.constant 0 : index
    %c0_94 = arith.constant 0 : index
    %121 = vector.load %arg17[%c0_92, %c0_93, %c0_94] : memref<1x1x128xf32, #tpu.memory_space<vmem>>, vector<1x1x128xf32>
    %122 = vector.shape_cast %121 : vector<1x1x128xf32> to vector<1x128xf32>
    %123 = vector.shape_cast %115 : vector<1x128xf32> to vector<1x1x128xf32>
    tpu.vector_store %arg17[%c0_92, %c0_93, %c0_94], %123 {strides = array<i32>} : memref<1x1x128xf32, #tpu.memory_space<vmem>>, vector<1x1x128xf32>,
    return
  }
  func.func @transform_0(%arg0: i32) -> (i32, i32, i32) {
    %c0_i32 = arith.constant 0 : i32
    %c0_i32_0 = arith.constant 0 : i32
    %c0_i32_1 = arith.constant 0 : i32
    return %arg0, %c0_i32, %c0_i32_0 : i32, i32, i32
  }
  func.func @transform_1(%arg0: i32) -> (i32, i32, i32) {
    %c0_i32 = arith.constant 0 : i32
    %c0_i32_0 = arith.constant 0 : i32
    %c0_i32_1 = arith.constant 0 : i32
    %c0_i32_2 = arith.constant 0 : i32
    return %c0_i32, %c0_i32_0, %c0_i32_1 : i32, i32, i32
  }
  func.func @transform_2(%arg0: i32) -> (i32, i32) {
    %c0_i32 = arith.constant 0 : i32
    %c0_i32_0 = arith.constant 0 : i32
    %c0_i32_1 = arith.constant 0 : i32
    return %c0_i32, %c0_i32_0 : i32, i32
  }
  func.func @transform_3(%arg0: i32) -> (i32, i32) {
    %c0_i32 = arith.constant 0 : i32
    %c0_i32_0 = arith.constant 0 : i32
    %c0_i32_1 = arith.constant 0 : i32
    return %c0_i32, %c0_i32_0 : i32, i32
  }
  func.func @transform_4(%arg0: i32) -> (i32, i32) {
    %c0_i32 = arith.constant 0 : i32
    %c0_i32_0 = arith.constant 0 : i32
    %c0_i32_1 = arith.constant 0 : i32
    return %c0_i32, %c0_i32_0 : i32, i32
  }
  func.func @transform_5(%arg0: i32) -> (i32, i32, i32) {
    %c0_i32 = arith.constant 0 : i32
    %c0_i32_0 = arith.constant 0 : i32
    %c0_i32_1 = arith.constant 0 : i32
    %c0_i32_2 = arith.constant 0 : i32
    return %c0_i32, %c0_i32_0, %c0_i32_1 : i32, i32, i32
  }
  func.func @transform_6(%arg0: i32) -> (i32, i32) {
    %c0_i32 = arith.constant 0 : i32
    %c0_i32_0 = arith.constant 0 : i32
    %c0_i32_1 = arith.constant 0 : i32
    return %c0_i32, %c0_i32_0 : i32, i32
  }
  func.func @transform_7(%arg0: i32) -> (i32, i32) {
    %c0_i32 = arith.constant 0 : i32
    %c0_i32_0 = arith.constant 0 : i32
    %c0_i32_1 = arith.constant 0 : i32
    return %c0_i32, %c0_i32_0 : i32, i32
  }
  func.func @transform_8(%arg0: i32) -> (i32, i32) {
    %c0_i32 = arith.constant 0 : i32
    %c0_i32_0 = arith.constant 0 : i32
    %c0_i32_1 = arith.constant 0 : i32
    return %c0_i32, %c0_i32_0 : i32, i32
  }
  func.func @transform_9(%arg0: i32) -> (i32, i32, i32) {
    %c0_i32 = arith.constant 0 : i32
    %c0_i32_0 = arith.constant 0 : i32
    %c0_i32_1 = arith.constant 0 : i32
    %c0_i32_2 = arith.constant 0 : i32
    return %c0_i32, %c0_i32_0, %c0_i32_1 : i32, i32, i32
  }
  func.func @transform_10(%arg0: i32) -> (i32, i32) {
    %c0_i32 = arith.constant 0 : i32
    %c0_i32_0 = arith.constant 0 : i32
    %c0_i32_1 = arith.constant 0 : i32
    return %c0_i32, %c0_i32_0 : i32, i32
  }
  func.func @transform_11(%arg0: i32) -> (i32, i32) {
    %c0_i32 = arith.constant 0 : i32
    %c0_i32_0 = arith.constant 0 : i32
    %c0_i32_1 = arith.constant 0 : i32
    return %c0_i32, %c0_i32_0 : i32, i32
  }
  func.func @transform_12(%arg0: i32) -> (i32, i32) {
    %c0_i32 = arith.constant 0 : i32
    %c0_i32_0 = arith.constant 0 : i32
    %c0_i32_1 = arith.constant 0 : i32
    return %c0_i32, %c0_i32_0 : i32, i32
  }
  func.func @transform_13(%arg0: i32) -> (i32, i32) {
    %c0_i32 = arith.constant 0 : i32
    %c0_i32_0 = arith.constant 0 : i32
    %c0_i32_1 = arith.constant 0 : i32
    return %c0_i32, %c0_i32_0 : i32, i32
  }
  func.func @transform_14(%arg0: i32) -> (i32, i32) {
    %c0_i32 = arith.constant 0 : i32
    %c0_i32_0 = arith.constant 0 : i32
    %c0_i32_1 = arith.constant 0 : i32
    return %c0_i32, %c0_i32_0 : i32, i32
  }
  func.func @transform_15(%arg0: i32) -> (i32, i32, i32) {
    %c0_i32 = arith.constant 0 : i32
    %c0_i32_0 = arith.constant 0 : i32
    %c0_i32_1 = arith.constant 0 : i32
    return %arg0, %c0_i32, %c0_i32_0 : i32, i32, i32
  }
  func.func @transform_16(%arg0: i32) -> (i32, i32, i32) {
    %c0_i32 = arith.constant 0 : i32
    %c0_i32_0 = arith.constant 0 : i32
    %c0_i32_1 = arith.constant 0 : i32
    return %arg0, %c0_i32, %c0_i32_0 : i32, i32, i32
  }
}

</mosaic_0001>

<bundles_post_ra>
// kernel: lenet5_forward.1
= control target key start
LH: loop header
LB: loop body
LE: loop exit
PB: predicated region body
PF: predicated region fallthrough
CT: control target
= control target key end

     0   :  { %s5212_s0 = inlined_call_operand.vmem [shape: f32[2,32,32], index: 0, kind: input, shape index: {}]   ;;  %s5213_s1 = inlined_call_operand.vmem [shape: f32[5,32,168], index: 1, kind: input, shape index: {}]   ;;  %s5214_s2 = inlined_call_operand.vmem [shape: f32[1,168], index: 2, kind: input, shape index: {}]   ;;  %s5215_s3 = inlined_call_operand.vmem [shape: f32[14,28], index: 3, kind: input, shape index: {}]   ;;  %s5216_s4 = inlined_call_operand.vmem [shape: f32[168,84], index: 4, kind: input, shape index: {}]   ;;  %s5217_s5 = inlined_call_operand.vmem [shape: f32[5,84,160], index: 5, kind: input, shape index: {}]   ;;  %s5218_s6 = inlined_call_operand.vmem [shape: f32[1,160], index: 6, kind: input, shape index: {}]   ;;  %s5219_s7 = inlined_call_operand.vmem [shape: f32[5,10], index: 7, kind: input, shape index: {}]   ;;  %s5220_s8 = inlined_call_operand.vmem [shape: f32[160,80], index: 8, kind: input, shape index: {}]   ;;  %s5221_s9 = inlined_call_operand.vmem [shape: f32[5,80,120], index: 9, kind: input, shape index: {}]   ;;  %s5222_s10 = inlined_call_operand.vmem [shape: f32[1,120], index: 10, kind: input, shape index: {}]   ;;  %s5223_s11 = inlined_call_operand.vmem [shape: f32[120,84], index: 11, kind: input, shape index: {}]   ;;  %s5224_s12 = inlined_call_operand.vmem [shape: f32[1,84], index: 12, kind: input, shape index: {}]   ;;  %s5225_s13 = inlined_call_operand.vmem [shape: f32[84,128], index: 13, kind: input, shape index: {}]   ;;  %s5226_s14 = inlined_call_operand.vmem [shape: f32[1,128], index: 14, kind: input, shape index: {}]   ;;  %s5227_s15 = inlined_call_operand.hbm [shape: f32[2,1,128], index: 15, kind: output, shape index: {0}]   ;;  %s5228_s16 = inlined_call_operand.hbm [shape: f32[2,1,128], index: 16, kind: output, shape index: {1}]  }
   0x1   :  { %5236 = sst [smem:[#allocation14_spill]] %s5212_s0 }
   0x2   :  { %5237 = sst [smem:[#allocation15_spill]] %s5228_s16 }
   0x3   :  { %22 = vsyncpa [#allocation3], 0 }
   0x4   :  { %24 = vsyncpa [#allocation3 + $0x1], 0 }
   0x5   :  { %25 = vsyncpa [#allocation5], 0 }
   0x6   :  { %27 = vsyncpa [#allocation5 + $0x1], 0  ;;  %s3982_s21 = smov 0   ;;  %s3984_s22 = smov 0  }
   0x7   :  { %s3986_s23 = smov 0   ;;  %s3988_s24 = smov 0  }
   0x8 LB: > { %5238 = sst [smem:[#allocation8_spill]] %s3877_s21  ;;  %s4003_s25 = sadd.s32 4294967295, %s3889_s24   ;;  %s3889_s24 = sphi %s3988_s24, %s5252_s24   ;;  %s3885_s23 = sphi %s3986_s23, %s5254_s23   ;;  %s3881_s22 = sphi %s3984_s22, %s5256_s22   ;;  %s3877_s21 = sphi %s3982_s21, %s5255_s21  }
   0x9   : > { %5239 = sst [smem:[#allocation9_spill]] %s3885_s23  ;;  %s2855_s26 = sadd.s32 4294967294, %s3889_s24  }
   0xa   : > { %5240 = sst [smem:[#allocation10_spill]] %s3889_s24  ;;  %s4007_s27 = sadd.s32 1, %s3889_s24  }
   0xb   : > { %5241 = sst [smem:[#allocation11_spill]] %s4007_s27  ;;  %s360_s28 = sadd.s32 1, %s3885_s23 }
   0xc   : > { %s357_s29 = ssub.s32 %s3889_s24, %s4007_s27  ;;  %p370_p0 = scmp.ne.s32.totalorder %s3885_s23, %s3881_s22 }
   0xd   : > { %p358_p1 = scmp.eq.s32.totalorder %s357_s29, 0  ;;  %p371_p2 = scmp.eq.s32.totalorder %s4003_s25, 1 }
   0xe   : > { %p376_p3 = scmp.ne.s32.totalorder %s3881_s22, %s3877_s21  ;;  %p377_p4 = scmp.eq.s32.totalorder %s2855_s26, 1 }
   0xf   : > { %s4018_s30 = scalar_select %p358_p1, %s3885_s23, %s360_s28  }
  0x10   : > { %p4020_p5 = por %p371_p2, %p370_p0  ;;  %p4024_p6 = por %p377_p4, %p376_p3 }
  0x11   : > { %5242 = sst [smem:[#allocation12_spill]] %s4018_s30  ;;  %p2858_p7 = scmp.ge.s32.totalorder %s3889_s24, 1 }
  0x12   : > { %s5244_s17 = scalar_select %p4024_p6, 1, 0 }
  0x13   : > { %p471_p8 = scmp.lt.s32.totalorder %s3889_s24, 3 }
  0x14   : > { %5245 = sst [smem:[#allocation13_spill]] %s5244_s17 }
  0x15   : > { %p472_p9 = pnand %p2858_p7, %p471_p8 }
  0x16   : > { %v2862_v0 = vld [vmem:[%s5213_s1 + $0x48] sm:$0xff] (!%p472_p9)  ;;  %v2864_v1 = vld [vmem:[%s5213_s1 + $0x58] sm:$0xff] (!%p472_p9)  ;;  %v2861_v2 = vld [vmem:[%s5213_s1 + $0x40] sm:$0xff] (!%p472_p9)  ;;  %p524_p10 = scmp.lt.s32.totalorder (!%p472_p9), %s4003_s25, 1  ;;  %v3891_v7 = vmov (!%p472_p9), 0.0   ;;  %s5246_s30 = sld [smem:[#allocation14_spill]] (!%p472_p9) }
  0x17   : > { %475 = sbr.rel (%p472_p9) target bundleno = 2568 (0xa08), region = 80  ;;  %v3340_v3 = vpack.c.bf16 (!%p472_p9), %v2864_v1, %v2862_v0  ;;  %v2863_v4 = vld [vmem:[%s5213_s1 + $0x50] sm:$0xff] (!%p472_p9)  ;;  %v2866_v5 = vld [vmem:[%s5213_s1 + $0x68] sm:$0xff] (!%p472_p9)  ;;  %v2868_v6 = vld [vmem:[%s5213_s1 + $0x78] sm:$0xff] (!%p472_p9)  ;;  %635 = vmatprep.mubr.f32.mxu0 (!%p472_p9), %v3891_v7  ;;  %1230 = vmatprep.mubr.f32.mxu1 (!%p472_p9), %v3891_v7  ;;  %vm554_vm0 = vcmask (!%p472_p9), 1046528   ;;  %vm562_vm1 = vcmask (!%p472_p9), 261120  }
  0x18   : > { %v3342_v8 = vpack.c.bf16 (!%p472_p9), %v2863_v4, %v2861_v2  ;;  %v3344_v9 = vpack.c.bf16 (!%p472_p9), %v2868_v6, %v2866_v5  ;;  %v2865_v10 = vld [vmem:[%s5213_s1 + $0x60] sm:$0xff] (!%p472_p9)  ;;  %v2867_v11 = vld [vmem:[%s5213_s1 + $0x70] sm:$0xff] (!%p472_p9)  ;;  %v534_v12 = vld [vmem:[%s5213_s1 + $0x8] sm:$0xff] (!%p472_p9)  ;;  %vm1010_vm2 = vcmask (!%p472_p9), 1043456   ;;  %vm766_vm3 = vcmask (!%p472_p9), 1045504   ;;  %s3079_s26 = sshll.u32 (!%p472_p9), %s4003_s25, 4 }
  0x19   : > { %3341 = vmatprep.subr.bf16.mxu0 (!%p472_p9), %v3340_v3  ;;  %v536_v13 = vld [vmem:[%s5213_s1 + $0x18] sm:$0xff] (!%p472_p9)  ;;  %v3346_v14 = vpack.c.bf16 (!%p472_p9), %v2867_v11, %v2865_v10  ;;  %v533_v15 = vld [vmem:[%s5213_s1] sm:$0xff] (!%p472_p9)  ;;  %v535_v17 = vld [vmem:[%s5213_s1 + $0x10] sm:$0xff] (!%p472_p9)  ;;  %vm888_vm4 = vcmask (!%p472_p9), 1044480   ;;  %vm3892_vm5 = vmmov (!%p472_p9), 1   ;;  %vm1153_vm7 = vcmask (!%p472_p9), 228352   ;;  %s5143_s17 = scalar_lea.hbm (!%p472_p9), %s5227_s15, %s3079_s26 }
  0x1a   : > { %3343 = vmatpush1.bf16.msra.mxu0 (!%p472_p9), %v3342_v8  ;;  %v3348_v16 = vpack.c.bf16 (!%p472_p9), %v536_v13, %v534_v12  ;;  %v538_v18 = vld [vmem:[%s5213_s1 + $0x28] sm:$0xff] (!%p472_p9)  ;;  %v540_v19 = vld [vmem:[%s5213_s1 + $0x38] sm:$0xff] (!%p472_p9)  ;;  %v3350_v26 = vpack.c.bf16 (!%p472_p9), %v535_v17, %v533_v15  ;;  %v537_v30 = vld [vmem:[%s5213_s1 + $0x20] sm:$0xff] (!%p472_p9)  ;;  %vm1264_vm8 = vcmask (!%p472_p9), 326656   ;;  %vm1396_vm9 = vcmask (!%p472_p9), 687104   ;;  %s3895_s18 = smov (!%p472_p9), [#allocation2]  }
  0x1b   : > { %3345 = vmatprep.subr.bf16.mxu0 (!%p472_p9), %v3344_v9  ;;  %v3352_v29 = vpack.c.bf16 (!%p472_p9), %v540_v19, %v538_v18  ;;  %v539_v31 = vld [vmem:[%s5213_s1 + $0x30] sm:$0xff] (!%p472_p9)  ;;  %v2878_v32 = vld [vmem:[%s5213_s1 + $0x88] sm:$0xff] (!%p472_p9)  ;;  %v2880_v33 = vld [vmem:[%s5213_s1 + $0x98] sm:$0xff] (!%p472_p9)  ;;  %vm1947_vm10 = vcmask (!%p472_p9), 1041408   ;;  %vm1943_vm12 = vcmask (!%p472_p9), 80896   ;;  %vm3894_vm13 = vmmov (!%p472_p9), 0  }
  0x1c   : > { %v3354_v36 = vpack.c.bf16 (!%p472_p9), %v539_v31, %v537_v30  ;;  %v3356_v37 = vpack.c.bf16 (!%p472_p9), %v2880_v33, %v2878_v32  ;;  %v2877_v46 = vld [vmem:[%s5213_s1 + $0x80] sm:$0xff] (!%p472_p9)  ;;  %v2879_v47 = vld [vmem:[%s5213_s1 + $0x90] sm:$0xff] (!%p472_p9)  ;;  %v2882_v48 = vld [vmem:[%s5213_s1 + $0xa8] sm:$0xff] (!%p472_p9)  ;;  %v1125_v31 = vlaneseq (!%p472_p9)  ;;  %vm2141_vm14 = vcmask (!%p472_p9), 654336  }
  0x1d   : > { %v2884_v49 = vld [vmem:[%s5213_s1 + $0xb8] sm:$0xff] (!%p472_p9)  ;;  %v3358_v50 = vpack.c.bf16 (!%p472_p9), %v2879_v47, %v2877_v46  ;;  %v2881_v52 = vld [vmem:[%s5213_s1 + $0xa0] sm:$0xff] (!%p472_p9)  ;;  %v2883_v53 = vld [vmem:[%s5213_s1 + $0xb0] sm:$0xff] (!%p472_p9)  ;;  %vm2560_vm15 = vcmask (!%p472_p9), 982016  }
  0x1e   : > { %s525_s27 = scalar_select %p524_p10, %s4003_s25, 1  ;;  %3347 = vmatpush1.bf16.msra.mxu0 %v3346_v14  ;;  %v3360_v51 = vpack.c.bf16 %v2884_v49, %v2882_v48  ;;  %v2890_v54 = vld [vmem:[%s5213_s1 + $0xc8] sm:$0xff]  ;;  %v2892_v55 = vld [vmem:[%s5213_s1 + $0xd8] sm:$0xff]  ;;  %v3362_v56 = vpack.c.bf16 %v2883_v53, %v2881_v52  ;;  %v2889_v60 = vld [vmem:[%s5213_s1 + $0xc0] sm:$0xff]  ;;  %v4251_v32 = vshrl.u32 %v1125_v31, 7 }
  0x1f   : > { %3349 = vmatprep.subr.bf16.mxu0 %v3348_v16  ;;  %v3364_v57 = vpack.c.bf16 %v2892_v55, %v2890_v54  ;;  %v2891_v61 = vld [vmem:[%s5213_s1 + $0xd0] sm:$0xff]  ;;  %v2894_v62 = vld [vmem:[%s5213_s1 + $0xe8] sm:$0xff]  ;;  %v2896_v63 = vld [vmem:[%s5213_s1 + $0xf8] sm:$0xff] }
  0x20   : > { %s3083_s19 = sshll.u32 %s525_s27, 5  ;;  %v3366_v2 = vpack.c.bf16 %v2891_v61, %v2889_v60  ;;  %v3368_v3 = vpack.c.bf16 %v2896_v63, %v2894_v62  ;;  %v2893_v4 = vld [vmem:[%s5213_s1 + $0xe0] sm:$0xff]  ;;  %v2895_v5 = vld [vmem:[%s5213_s1 + $0xf0] sm:$0xff]  ;;  %v2902_v6 = vld [vmem:[%s5213_s1 + $0x108] sm:$0xff]  ;;  %v1127_v33 = vsub.s32 0, %v4251_v32  ;;  %s3799_s27 = sshll.u32 %s3895_s18, 4  ;;  %s3800_s27 = int_to_ptr.vmem [resolvable:$false] %s3799_s27 }
  0x21   : > { %s528_s24 = scalar_lea.vmem %s5246_s30, %s3083_s19  ;;  %v2904_v8 = vld [vmem:[%s5213_s1 + $0x118] sm:$0xff]  ;;  %v3370_v11 = vpack.c.bf16 %v2895_v5, %v2893_v4  ;;  %v2901_v16 = vld [vmem:[%s5213_s1 + $0x100] sm:$0xff]  ;;  %v2903_v17 = vld [vmem:[%s5213_s1 + $0x110] sm:$0xff]  ;;  %v3893_v5 = vmov 0.0|0.0   ;;  %s5134_s19 = sand.u32 1, %s3881_s22  }
  0x22   : > { %v4079_v20 = vld [vmem:[%s528_s24] sm:$0xff]  ;;  %v4081_v21 = vld [vmem:[%s528_s24 + $0x8] sm:$0xff]  ;;  %v4083_v22 = vld [vmem:[%s528_s24 + $0x10] sm:$0xff]  ;;  %v3372_v12 = vpack.c.bf16 %v2904_v8, %v2902_v6  ;;  %s517_s20 = scalar_lea.vmem [#allocation2], %s5134_s19  ;;  %s2743_s28 = scalar_lea.sflag [#allocation3], %s5134_s19 }
  0x23   : > { %v555_v23 = vrot.slane %v4079_v20, 1  ;;  %v556_v24 = vrot.slane %v4081_v21, 1  ;;  %v558_v25 = vrot.slane %v4083_v22, 1  ;;  %v4089_v28 = vld [vmem:[%s528_s24 + $0x18] sm:$0xff]  ;;  %v1011_v38 = vrot.slane %v4079_v20, 4  ;;  %v2906_v18 = vld [vmem:[%s5213_s1 + $0x128] sm:$0xff]  ;;  %vm3385_vm6 = vmpackc.low %vm1010_vm2, %vm3892_vm5 }
  0x24   : > { %v560_v35 = vrot.slane %v4089_v28, 1  ;;  %v1012_v39 = vrot.slane %v4081_v21, 4  ;;  %v1014_v40 = vrot.slane %v4083_v22, 4  ;;  %v1016_v43 = vrot.slane %v4089_v28, 4  ;;  %v2908_v19 = vld [vmem:[%s5213_s1 + $0x138] sm:$0xff]  ;;  %v1245_v6 = vld [vmem:[%s5216_s4 + $0x10] sm:$0xff]  ;;  %vm3521_vm11 = vmpackc.low %vm1947_vm10, %vm3892_vm5 }
  0x25   : > { %v557_v27 = vsel %vm554_vm0, %v555_v23, %v556_v24  ;;  %v559_v34 = vsel %vm554_vm0, %v556_v24, %v558_v25  ;;  %v767_v58 = vrot.slane %v4079_v20, 2  ;;  %v768_v59 = vrot.slane %v4081_v21, 2  ;;  %v1246_v8 = vld [vmem:[%s5216_s4 + $0x18] sm:$0xff]  ;;  %s2759_s24 = sshll.u32 %s517_s20, 4  ;;  %s3801_s16 = scalar_lea.vmem %s3800_s27, 32  ;;  %s2760_s24 = int_to_ptr.vmem [resolvable:$true] %s2759_s24 }
  0x26   : > { %2869 = vmatmul.mubr.msk.f32.vlgmr.msra.gmra.mrb[0].mxu0 %vm562_vm1, %v557_v27  ;;  %v561_v41 = vsel %vm554_vm0, %v558_v25, %v560_v35  ;;  %v4114_v42 = vsel %vm1010_vm2, %v1011_v38, %v1012_v39  ;;  %v4118_v44 = vsel %vm1010_vm2, %v1012_v39, %v1014_v40  ;;  %v4123_v45 = vsel %vm1010_vm2, %v1014_v40, %v1016_v43  ;;  %v2905_v25 = vld [vmem:[%s5213_s1 + $0x120] sm:$0xff]  ;;  %s3795_s29 = scalar_lea.vmem %s2760_s24, 16  ;;  %p3802_p0 = scmp.lt.s32.totalorder %s2760_s24, %s3800_s27 }
  0x27   : > { %641 = vmatprep.mubr.f32.mxu0 %v3891_v7  ;;  %3351 = vmatpush1.bf16.msra.mxu0 %v3350_v26  ;;  %v769_v0 = vsel %vm766_vm3, %v767_v58, %v768_v59  ;;  %v770_v1 = vrot.slane %v4083_v22, 2  ;;  %v772_v10 = vrot.slane %v4089_v28, 2  ;;  %v889_v14 = vrot.slane %v4079_v20, 3  ;;  %v2907_v26 = vld [vmem:[%s5213_s1 + $0x130] sm:$0xff]  ;;  %p3796_p11 = scmp.ne.s32.totalorder %s2760_s24, %s3795_s29  ;;  %p3803_p1 = scmp.lt.s32.totalorder %s3801_s16, %s3795_s29 }
  0x28   : > { %3353 = vmatprep.subr.bf16.mxu0 %v3352_v29  ;;  %v890_v15 = vrot.slane %v4081_v21, 3  ;;  %v3374_v23 = vpack.c.bf16 %v2903_v17, %v2901_v16  ;;  %v3376_v24 = vpack.c.bf16 %v2908_v19, %v2906_v18  ;;  %v894_v29 = vrot.slane %v4089_v28, 3  ;;  %v1251_v17 = vld [vmem:[%s5216_s4 + $0x40] sm:$0xff]  ;;  %v1252_v18 = vld [vmem:[%s5216_s4 + $0x48] sm:$0xff] }
  0x29   : > { %v771_v9 = vsel %vm766_vm3, %v768_v59, %v770_v1  ;;  %v773_v13 = vsel %vm766_vm3, %v770_v1, %v772_v10  ;;  %v1243_v1 = vld [vmem:[%s5216_s4] sm:$0xff]  ;;  %v3403_v19 = vpack.c.bf16 %v1252_v18, %v1251_v17  ;;  %p3797_p12 = pnand %p3796_p11, %p4020_p5  ;;  %p3804_p2 = por %p3803_p1, %p3802_p0 }
  0x2a   : > { %2870 = vmatmul.mubr.msk.f32.gmra.mrb[2].mxu0 %vm562_vm1, %v559_v34  ;;  %v1123_v34 = vld [vmem:[%s5214_s2] sm:$0x3] }
  0x2b   : > { %647 = vmatprep.mubr.f32.mxu0 %v3891_v7  ;;  %3355 = vmatpush1.bf16.msra.mxu0 %v3354_v36  ;;  %v1128_v36 = vrot.slane %v1123_v34, %v1127_v33  ;;  %v1346_v18 = vld [vmem:[%s5217_s5] sm:$0xff]  ;;  %p3798_p13 = pneg %p3797_p12 }
  0x2c   : > { %3357 = vmatprep.subr.bf16.mxu0 %v3356_v37 }
  0x2d   : > { %p3805_p3 = pnand %p3804_p2, %p3798_p13 }
  0x2e   : > { %2871 = vmatmul.mubr.msk.f32.gmra.mrb[4].mxu0 %vm562_vm1, %v561_v41 }
  0x2f   : > { %653 = vmatprep.mubr.f32.mxu0 %v3891_v7 }
  0x32   : > { %2872 = vmatmul.mubr.msk.f32.gmra.mrb[6].mxu0 %vm562_vm1, %v560_v35  ;;  %v1131_v35 = vsub.s32 1, %v4251_v32 }
  0x33   : > { %732 = vmatprep.mubr.f32.mxu0 %v3891_v7 }
  0x36   : > { %2873 = vmatmul.mubr.msk.f32.vlgmr.msra.gmra.mrb[0].mxu0 %vm562_vm1, %v4079_v20  ;;  %v891_v20 = vsel %vm888_vm4, %v889_v14, %v890_v15  ;;  %v1249_v14 = vld [vmem:[%s5216_s4 + $0x30] sm:$0xff] }
  0x37   : > { %738 = vmatprep.mubr.f32.mxu0 %v3891_v7  ;;  %3359 = vmatpush1.bf16.msra.mxu0 %v3358_v50 }
  0x38   : > { %3361 = vmatprep.subr.bf16.mxu0 %v3360_v51 }
  0x3a   : > { %2874 = vmatmul.mubr.msk.f32.gmra.mrb[2].mxu0 %vm562_vm1, %v4081_v21  ;;  %v892_v21 = vrot.slane %v4083_v22, 3 }
  0x3b   : > { %744 = vmatprep.mubr.f32.mxu0 %v3891_v7  ;;  %3363 = vmatpush1.bf16.msra.mxu0 %v3362_v56 }
  0x3c   : > { %3365 = vmatprep.subr.bf16.mxu0 %v3364_v57  ;;  %v893_v27 = vsel %vm888_vm4, %v890_v15, %v892_v21  ;;  %v895_v30 = vsel %vm888_vm4, %v892_v21, %v894_v29  ;;  %v1250_v15 = vld [vmem:[%s5216_s4 + $0x38] sm:$0xff] }
  0x3d   : > { %v3400_v16 = vpack.c.bf16 %v1250_v15, %v1249_v14  ;;  %v1254_v21 = vld [vmem:[%s5216_s4 + $0x58] sm:$0xff]  ;;  %v2939_v15 = vld [vmem:[%s5217_s5 + $0x150] sm:$0xf] }
  0x3e   : > { %2875 = vmatmul.mubr.msk.f32.gmra.mrb[4].mxu0 %vm562_vm1, %v4083_v22  ;;  %v3378_v22 = vpack.c.bf16 %v2907_v26, %v2905_v25  ;;  %v1256_v25 = vld [vmem:[%s5216_s4 + $0x68] sm:$0xff]  ;;  %v1349_v14 = vld [vmem:[%s5217_s5 + $0x18] sm:$0xff] }
  0x3f   : > { %750 = vmatprep.mubr.f32.mxu0 %v3891_v7 }
  0x42   : > { %2876 = vmatmul.mubr.msk.f32.gmra.mrb[6].mxu0 %vm562_vm1, %v4089_v28  ;;  %v1132_v28 = vrot.slane %v1123_v34, %v1131_v35  ;;  %v1260_v34 = vld [vmem:[%s5216_s4 + $0x88] sm:$0xff] }
  0x43   : > { %846 = vmatprep.mubr.f32.mxu0 %v3891_v7 }
  0x46   : > { %2885 = vmatmul.mubr.msk.f32.vlgmr.msra.gmra.mrb[0].mxu0 %vm562_vm1, %v769_v0 }
  0x47   : > { %852 = vmatprep.mubr.f32.mxu0 %v3891_v7  ;;  %3367 = vmatpush1.bf16.msra.mxu0 %v3366_v2  ;;  %v1244_v2 = vld [vmem:[%s5216_s4 + $0x8] sm:$0xff] }
  0x48   : > { %3369 = vmatprep.subr.bf16.mxu0 %v3368_v3  ;;  %v1151_v3 = vld [vmem:[%s5215_s3] sm:$0xff]  ;;  %v3391_v4 = vpack.c.bf16 %v1244_v2, %v1243_v1  ;;  %v2931_v1 = vld [vmem:[%s5217_s5 + $0x110] sm:$0xff] }
  0x49   : > { %v2933_v2 = vld [vmem:[%s5217_s5 + $0x120] sm:$0xff] }
  0x4a   : > { %2886 = vmatmul.mubr.msk.f32.gmra.mrb[2].mxu0 %vm562_vm1, %v771_v9  ;;  %v1152_v9 = vld [vmem:[%s5215_s3 + $0x8] sm:$0x3f] }
  0x4b   : > { %858 = vmatprep.mubr.f32.mxu0 %v3891_v7  ;;  %3371 = vmatpush1.bf16.msra.mxu0 %v3370_v11  ;;  %v1247_v11 = vld [vmem:[%s5216_s4 + $0x20] sm:$0xff] }
  0x4c   : > { %3373 = vmatprep.subr.bf16.mxu0 %v3372_v12  ;;  %v1248_v12 = vld [vmem:[%s5216_s4 + $0x28] sm:$0xff] }
  0x4e   : > { %2887 = vmatmul.mubr.msk.f32.gmra.mrb[4].mxu0 %vm562_vm1, %v773_v13  ;;  %v3397_v13 = vpack.c.bf16 %v1248_v12, %v1247_v11  ;;  %v2940_v12 = vld [vmem:[%s5217_s5 + $0x158] sm:$0xf] }
  0x4f   : > { %864 = vmatprep.mubr.f32.mxu0 %v3891_v7 }
  0x52   : > { %2888 = vmatmul.mubr.msk.f32.gmra.mrb[6].mxu0 %vm562_vm1, %v772_v10  ;;  %v3394_v10 = vpack.c.bf16 %v1246_v8, %v1245_v6  ;;  %v2938_v6 = vld [vmem:[%s5217_s5 + $0x148] sm:$0xff] }
  0x53   : > { %968 = vmatprep.mubr.f32.mxu0 %v3891_v7 }
  0x56   : > { %2897 = vmatmul.mubr.msk.f32.vlgmr.msra.gmra.mrb[0].mxu0 %vm562_vm1, %v891_v20  ;;  %v1253_v20 = vld [vmem:[%s5216_s4 + $0x50] sm:$0xff] }
  0x57   : > { %974 = vmatprep.mubr.f32.mxu0 %v3891_v7  ;;  %3375 = vmatpush1.bf16.msra.mxu0 %v3374_v23  ;;  %v3406_v23 = vpack.c.bf16 %v1254_v21, %v1253_v20 }
  0x58   : > { %3377 = vmatprep.subr.bf16.mxu0 %v3376_v24  ;;  %v1255_v24 = vld [vmem:[%s5216_s4 + $0x60] sm:$0xff] }
  0x59   : > { %v3409_v26 = vpack.c.bf16 %v1256_v25, %v1255_v24  ;;  %v1353_v24 = vld [vmem:[%s5217_s5 + $0x38] sm:$0xff] }
  0x5a   : > { %2898 = vmatmul.mubr.msk.f32.gmra.mrb[2].mxu0 %vm562_vm1, %v893_v27  ;;  %v1257_v27 = vld [vmem:[%s5216_s4 + $0x70] sm:$0xff] }
  0x5b   : > { %980 = vmatprep.mubr.f32.mxu0 %v3891_v7  ;;  %3379 = vmatpush1.bf16.msra.mxu0 %v3378_v22 }
  0x5e   : > { %2899 = vmatmul.mubr.msk.f32.gmra.mrb[4].mxu0 %vm562_vm1, %v895_v30  ;;  %v1259_v30 = vld [vmem:[%s5216_s4 + $0x80] sm:$0xff] }
  0x5f   : > { %986 = vmatprep.mubr.f32.mxu0 %v3891_v7 }
  0x62   : > { %2900 = vmatmul.mubr.msk.f32.gmra.mrb[6].mxu0 %vm562_vm1, %v894_v29  ;;  %v1258_v29 = vld [vmem:[%s5216_s4 + $0x78] sm:$0xff] }
  0x63   : > { %1090 = vmatprep.mubr.f32.mxu0 %v3891_v7  ;;  %v3412_v22 = vpack.c.bf16 %v1258_v29, %v1257_v27 }
  0x66   : > { %2909 = vmatmul.mubr.msk.f32.vlgmr.msra.gmra.mrb[0].mxu0 %vm562_vm1, %v4114_v42 }
  0x67   : > { %1096 = vmatprep.mubr.f32.mxu0 %v3891_v7 }
  0x6a   : > { %2910 = vmatmul.mubr.msk.f32.gmra.mrb[2].mxu0 %vm562_vm1, %v4118_v44 }
  0x6b   : > { %1102 = vmatprep.mubr.f32.mxu0 %v3891_v7 }
  0x6e   : > { %2911 = vmatmul.mubr.msk.f32.gmra.mrb[4].mxu0 %vm562_vm1, %v4123_v45 }
  0x6f   : > { %1108 = vmatprep.mubr.f32.mxu0 %v3891_v7 }
  0x72   : > { %2912 = vmatmul.mubr.msk.f32.gmra.mrb[6].mxu0 %vm562_vm1, %v1016_v43 }
  0x73   : > { %2018 = vmatprep.mubr.f32.mxu0 %v3891_v7 }
 0x139   : > { %v1092_v37 = vpop.f32.mrb[0].mxu0 }
 0x13a   : > { %v1135_v38 = vadd.f32 %v1128_v36, %v1092_v37  ;;  %v1094_v39 = vpop.f32.mrb[1].mxu0  ;;  %v1262_v37 = vld [vmem:[%s5216_s4 + $0x98] sm:$0xff] }
 0x13b   : > { %v1136_v40 = vadd.f32 %v1132_v28, %v1094_v39  ;;  %v1263_v39 = vld [vmem:[%s5216_s4 + $0xa0] sm:$0xff] }
 0x13c   : > { %3763 = vtanh.f32 %v1135_v38 }
 0x13d   : > { %v1098_v41 = vpop.f32.mrb[2].mxu0  ;;  %3765 = vtanh.f32 %v1136_v40  ;;  %v2920_v40 = vld [vmem:[%s5217_s5 + $0xb8] sm:$0xff] }
 0x13e   : > { %v1137_v42 = vadd.f32 %v1128_v36, %v1098_v41  ;;  %v1100_v43 = vpop.f32.mrb[3].mxu0  ;;  %v2922_v41 = vld [vmem:[%s5217_s5 + $0xc8] sm:$0xff] }
 0x13f   : > { %v1138_v44 = vadd.f32 %v1132_v28, %v1100_v43  ;;  %v2919_v43 = vld [vmem:[%s5217_s5 + $0xb0] sm:$0xff] }
 0x140   : > { %3767 = vtanh.f32 %v1137_v42  ;;  %v3420_v42 = vpack.c.bf16 %v2922_v41, %v2920_v40  ;;  %v1352_v40 = vld [vmem:[%s5217_s5 + $0x30] sm:$0xff] }
 0x141   : > { %3769 = vtanh.f32 %v1138_v44  ;;  %v1104_v45 = vpop.f32.mrb[4].mxu0  ;;  %v2921_v44 = vld [vmem:[%s5217_s5 + $0xc0] sm:$0xff] }
 0x142   : > { %v1139_v46 = vadd.f32 %v1128_v36, %v1104_v45  ;;  %v1106_v47 = vpop.f32.mrb[5].mxu0  ;;  %v2924_v45 = vld [vmem:[%s5217_s5 + $0xd8] sm:$0xff] }
 0x143   : > { %v1140_v48 = vadd.f32 %v1132_v28, %v1106_v47 }
 0x144   : > { %3771 = vtanh.f32 %v1139_v46  ;;  %v2926_v46 = vld [vmem:[%s5217_s5 + $0xe8] sm:$0xff] }
 0x145   : > { %v1110_v49 = vpop.f32.mrb[6].mxu0  ;;  %3773 = vtanh.f32 %v1140_v48  ;;  %v3422_v48 = vpack.c.bf16 %v2921_v44, %v2919_v43  ;;  %v1357_v43 = vld [vmem:[%s5217_s5 + $0x58] sm:$0xff] }
 0x146   : > { %v1141_v50 = vadd.f32 %v1128_v36, %v1110_v49  ;;  %v1112_v51 = vpop.f32.mrb[7].mxu0  ;;  %v3764_v53 = vpop.eup %3763  ;;  %v3415_v36 = vpack.c.bf16 %v1260_v34, %v1259_v30 }
 0x147   : > { %v1142_v52 = vadd.f32 %v1132_v28, %v1112_v51  ;;  %v3766_v54 = vpop.eup %3765  ;;  %v1261_v28 = vld [vmem:[%s5216_s4 + $0x90] sm:$0xff] }
 0x148   : > { %3775 = vtanh.f32 %v1141_v50  ;;  %v3418_v38 = vpack.c.bf16 %v1262_v37, %v1261_v28  ;;  %v3424_v50 = vpack.c.bf16 %v2926_v46, %v2924_v45  ;;  %v2923_v51 = vld [vmem:[%s5217_s5 + $0xd0] sm:$0xff] }
 0x149   : > { %3777 = vtanh.f32 %v1142_v52  ;;  %v2925_v52 = vld [vmem:[%s5217_s5 + $0xe0] sm:$0xff] }
 0x14a   : > { %v3768_v55 = vpop.eup %3767 }
 0x14b   : > { %v3770_v56 = vpop.eup %3769  ;;  %v3382_v57 = vpack.c.bf16 %v3768_v55, %v3764_v53  ;;  %v2928_v53 = vld [vmem:[%s5217_s5 + $0xf8] sm:$0xff] }
 0x14c   : > { %v3380_v58 = vpack.c.bf16 %v3770_v56, %v3766_v54  ;;  %v2930_v54 = vld [vmem:[%s5217_s5 + $0x108] sm:$0xff]  ;;  %v3426_v56 = vpack.c.bf16 %v2925_v52, %v2923_v51  ;;  %v1361_v52 = vld [vmem:[%s5217_s5 + $0x78] sm:$0xff] }
 0x14d   : > { %v1359_v51 = vld [vmem:[%s5217_s5 + $0x68] sm:$0xff] }
 0x14e   : > { %3381 = vmatprep.subr.bf16.mxu1 %v3380_v58  ;;  %v3772_v59 = vpop.eup %3771  ;;  %v3428_v58 = vpack.c.bf16 %v2930_v54, %v2928_v53  ;;  %v3452_v54 = vpack.c.bf16 %v1361_v52, %v1359_v51  ;;  %v2982_v51 = vld [vmem:[%s5217_s5 + $0x248] sm:$0xff]  ;;  %v2969_v52 = vld [vmem:[%s5217_s5 + $0x200] sm:$0xf] }
 0x14f   : > { %3383 = vmatpush1.bf16.msra.mxu1 %v3382_v57  ;;  %v3774_v60 = vpop.eup %3773 }
 0x152   : > { %v3776_v61 = vpop.eup %3775 }
 0x153   : > { %v3778_v62 = vpop.eup %3777  ;;  %v3387_v63 = vpack.c.bf16 %v3776_v61, %v3772_v59  ;;  %v2927_v59 = vld [vmem:[%s5217_s5 + $0xf0] sm:$0xff]  ;;  %v2932_v61 = vld [vmem:[%s5217_s5 + $0x118] sm:$0xff] }
 0x154   : > { %v3384_v0 = vpack.c.bf16 %v3778_v62, %v3774_v60  ;;  %v2929_v60 = vld [vmem:[%s5217_s5 + $0x100] sm:$0xff]  ;;  %v2934_v62 = vld [vmem:[%s5217_s5 + $0x128] sm:$0xff] }
 0x156   : > { %3386 = vmatprep.subr.msk.bf16.mxu1 %vm3385_vm6, %v3384_v0  ;;  %v3432_v0 = vpack.c.bf16 %v2934_v62, %v2932_v61  ;;  %v1362_v61 = vld [vmem:[%s5217_s5 + $0x80] sm:$0xff]  ;;  %v1364_v62 = vld [vmem:[%s5217_s5 + $0x90] sm:$0xff] }
 0x157   : > { %3389 = vmatpush1.bf16.msk.msra.mxu1 %vm3385_vm6, %v3387_v63  ;;  %v3430_v63 = vpack.c.bf16 %v2929_v60, %v2927_v59 }
 0x158   : > { %3390 = vmatprep.subr.bf16.mxu1 %v3893_v5 }
 0x15a   : > { %2915 = vmatmul.mubr.msk.f32.vlgmr.msra.gmra.mrb[0].mxu1 %vm1153_vm7, %v1151_v3  ;;  %v3434_v3 = vpack.c.bf16 %v2933_v2, %v2931_v1  ;;  %v2950_v1 = vld [vmem:[%s5217_s5 + $0x168] sm:$0xff]  ;;  %v2952_v2 = vld [vmem:[%s5217_s5 + $0x178] sm:$0xff] }
 0x15b   : > { %1236 = vmatprep.mubr.f32.mxu1 %v3891_v7  ;;  %3392 = vmatpush1.bf16.msra.mxu1 %v3391_v4  ;;  %v2936_v4 = vld [vmem:[%s5217_s5 + $0x138] sm:$0xff] }
 0x15c   : > { %3393 = vmatprep.subr.bf16.mxu1 %v3893_v5  ;;  %v3436_v8 = vpack.c.bf16 %v2938_v6, %v2936_v4  ;;  %v2951_v4 = vld [vmem:[%s5217_s5 + $0x170] sm:$0xff]  ;;  %v2954_v6 = vld [vmem:[%s5217_s5 + $0x188] sm:$0xff] }
 0x15e   : > { %2916 = vmatmul.mubr.msk.f32.gmra.mrb[2].mxu1 %vm1153_vm7, %v1152_v9  ;;  %v2935_v9 = vld [vmem:[%s5217_s5 + $0x130] sm:$0xff] }
 0x15f   : > { %3395 = vmatpush1.bf16.msra.mxu1 %v3394_v10  ;;  %v2937_v10 = vld [vmem:[%s5217_s5 + $0x140] sm:$0xff] }
 0x160   : > { %3396 = vmatprep.subr.bf16.mxu1 %v3893_v5  ;;  %v3438_v11 = vpack.c.bf16 %v2937_v10, %v2935_v9  ;;  %v1366_v9 = vld [vmem:[%s5217_s5 + $0xa0] sm:$0xf]  ;;  %v3460_v10 = vpack.c.bf16 %v2952_v2, %v2950_v1 }
 0x163   : > { %3398 = vmatpush1.bf16.msra.mxu1 %v3397_v13  ;;  %v1347_v13 = vld [vmem:[%s5217_s5 + $0x8] sm:$0xff] }
 0x164   : > { %3399 = vmatprep.subr.bf16.mxu1 %v3893_v5 }
 0x167   : > { %3401 = vmatpush1.bf16.msra.mxu1 %v3400_v16  ;;  %v3440_v16 = vpack.c.bf16 %v1349_v14, %v1347_v13  ;;  %v2953_v13 = vld [vmem:[%s5217_s5 + $0x180] sm:$0xff]  ;;  %v2955_v14 = vld [vmem:[%s5217_s5 + $0x190] sm:$0xff] }
 0x168   : > { %3402 = vmatprep.subr.bf16.mxu1 %v3893_v5 }
 0x16b   : > { %3404 = vmatpush1.bf16.msra.mxu1 %v3403_v19  ;;  %v1348_v19 = vld [vmem:[%s5217_s5 + $0x10] sm:$0xff] }
 0x16c   : > { %3405 = vmatprep.subr.bf16.mxu1 %v3893_v5  ;;  %v3442_v21 = vpack.c.bf16 %v1348_v19, %v1346_v18  ;;  %v3466_v18 = vpack.c.bf16 %v2955_v14, %v2953_v13  ;;  %v2996_v13 = vld [vmem:[%s5217_s5 + $0x2b8] sm:$0xf]  ;;  %v3002_v14 = vld [vmem:[%s5217_s5 + $0x2c8] sm:$0xff] }
 0x16f   : > { %3407 = vmatpush1.bf16.msra.mxu1 %v3406_v23  ;;  %v1351_v23 = vld [vmem:[%s5217_s5 + $0x28] sm:$0xff] }
 0x170   : > { %3408 = vmatprep.subr.bf16.mxu1 %v3893_v5 }
 0x173   : > { %3410 = vmatpush1.bf16.msra.mxu1 %v3409_v26 }
 0x174   : > { %3411 = vmatprep.subr.bf16.mxu1 %v3893_v5 }
 0x177   : > { %3413 = vmatpush1.bf16.msra.mxu1 %v3412_v22 }
 0x178   : > { %3414 = vmatprep.subr.bf16.mxu1 %v3893_v5 }
 0x17b   : > { %3416 = vmatpush1.bf16.msra.mxu1 %v3415_v36 }
 0x17c   : > { %3417 = vmatprep.subr.bf16.mxu1 %v3893_v5 }
 0x17f   : > { %3419 = vmatpush1.bf16.msra.mxu1 %v3418_v38  ;;  %v3444_v38 = vpack.c.bf16 %v1353_v24, %v1351_v23  ;;  %v2962_v23 = vld [vmem:[%s5217_s5 + $0x1c8] sm:$0xff] }
 0x180   : > { %1311 = vmatprep.subr.mxu1 %v3891_v7 }
 0x183   : > { %1312 = vmatpush1.msra.mxu1 %v1263_v39  ;;  %v1350_v39 = vld [vmem:[%s5217_s5 + $0x20] sm:$0xff] }
 0x184   : > { %3421 = vmatprep.subr.bf16.mxu1 %v3420_v42  ;;  %v1355_v42 = vld [vmem:[%s5217_s5 + $0x48] sm:$0xff] }
 0x22d   : > { %v1232_v47 = vpop.f32.mrb[0].mxu1 }
 0x22e   : > { %v1234_v49 = vpop.f32.mrb[1].mxu1 }
 0x22f   : > { %2917 = vmatprep.mubr.msk.f32.mxu1 %vm1264_vm8, %v1234_v49  ;;  %v1354_v49 = vld [vmem:[%s5217_s5 + $0x40] sm:$0xff] }
 0x230   : > { %1336 = vmatmul.mubr.f32.vlgmr.msra.gmra.mrb[4].mxu1 %v1232_v47  ;;  %v3446_v47 = vpack.c.bf16 %v1352_v40, %v1350_v39  ;;  %v2965_v39 = vld [vmem:[%s5217_s5 + $0x1e0] sm:$0xff]  ;;  %v2967_v40 = vld [vmem:[%s5217_s5 + $0x1f0] sm:$0xff] }
 0x231   : > { %v1238_v55 = vpop.f32.mrb[2].mxu1  ;;  %3423 = vmatpush1.bf16.msra.mxu1 %v3422_v48  ;;  %v3448_v48 = vpack.c.bf16 %v1357_v43, %v1355_v42  ;;  %v2970_v42 = vld [vmem:[%s5217_s5 + $0x208] sm:$0xf]  ;;  %v2976_v43 = vld [vmem:[%s5217_s5 + $0x218] sm:$0xff] }
 0x232   : > { %v1240_v57 = vpop.f32.mrb[3].mxu1  ;;  %3425 = vmatprep.subr.bf16.mxu1 %v3424_v50  ;;  %v1356_v50 = vld [vmem:[%s5217_s5 + $0x50] sm:$0xff] }
 0x233   : > { %2918 = vmatprep.mubr.msk.f32.mxu1 %vm1264_vm8, %v1240_v57  ;;  %v3450_v53 = vpack.c.bf16 %v1356_v50, %v1354_v49  ;;  %v1363_v57 = vld [vmem:[%s5217_s5 + $0x88] sm:$0xff]  ;;  %v2977_v49 = vld [vmem:[%s5217_s5 + $0x220] sm:$0xff]  ;;  %v2980_v50 = vld [vmem:[%s5217_s5 + $0x238] sm:$0xff] }
 0x234   : > { %1341 = vmatmul.mubr.f32.gmra.mrb[6].mxu1 %v1238_v55  ;;  %v1358_v55 = vld [vmem:[%s5217_s5 + $0x60] sm:$0xff] }
 0x235   : > { %3427 = vmatpush1.bf16.msra.mxu1 %v3426_v56  ;;  %1471 = vmatprep.mubr.f32.mxu1 %v3891_v7  ;;  %v1360_v56 = vld [vmem:[%s5217_s5 + $0x70] sm:$0xff] }
 0x236   : > { %3429 = vmatprep.subr.bf16.mxu1 %v3428_v58  ;;  %v1365_v58 = vld [vmem:[%s5217_s5 + $0x98] sm:$0xff]  ;;  %v3454_v59 = vpack.c.bf16 %v1360_v56, %v1358_v55  ;;  %v3484_v55 = vpack.c.bf16 %v2982_v51, %v2980_v50  ;;  %v2979_v56 = vld [vmem:[%s5217_s5 + $0x230] sm:$0xff]  ;;  %v3017_v51 = vld [vmem:[%s5217_s5 + $0x340] sm:$0xff] }
 0x237   : > { %v3456_v60 = vpack.c.bf16 %v1365_v58, %v1363_v57  ;;  %v2981_v57 = vld [vmem:[%s5217_s5 + $0x240] sm:$0xff]  ;;  %v2984_v58 = vld [vmem:[%s5217_s5 + $0x258] sm:$0xff] }
 0x239   : > { %3431 = vmatpush1.bf16.msra.mxu1 %v3430_v63  ;;  %v3458_v63 = vpack.c.bf16 %v1364_v62, %v1362_v61  ;;  %v2983_v62 = vld [vmem:[%s5217_s5 + $0x250] sm:$0xff] }
 0x23a   : > { %3433 = vmatprep.subr.bf16.mxu1 %v3432_v0  ;;  %v1367_v0 = vld [vmem:[%s5217_s5 + $0xa8] sm:$0xf] }
 0x23d   : > { %3435 = vmatpush1.bf16.msra.mxu1 %v3434_v3  ;;  %v2949_v3 = vld [vmem:[%s5217_s5 + $0x160] sm:$0xff] }
 0x23e   : > { %3437 = vmatprep.subr.bf16.mxu1 %v3436_v8  ;;  %v2956_v8 = vld [vmem:[%s5217_s5 + $0x198] sm:$0xff] }
 0x241   : > { %3439 = vmatpush1.bf16.msra.mxu1 %v3438_v11  ;;  %v3462_v11 = vpack.c.bf16 %v2951_v4, %v2949_v3  ;;  %v2987_v3 = vld [vmem:[%s5217_s5 + $0x270] sm:$0xff]  ;;  %v2989_v4 = vld [vmem:[%s5217_s5 + $0x280] sm:$0xff] }
 0x242   : > { %2941 = vmatprep.subr.msk.mxu1 %vm1010_vm2, %v2940_v12  ;;  %v3464_v12 = vpack.c.bf16 %v2956_v8, %v2954_v6  ;;  %v2992_v6 = vld [vmem:[%s5217_s5 + $0x298] sm:$0xff]  ;;  %v3494_v8 = vpack.c.bf16 %v2989_v4, %v2987_v3  ;;  %v2026_v3 = vld [vmem:[%s5220_s8 + $0x8] sm:$0xff]  ;;  %v1942_v4 = vld [vmem:[%s5219_s7] sm:$0x1f] }
 0x245   : > { %2942 = vmatpush1.msk.msra.mxu1 %vm1010_vm2, %v2939_v15  ;;  %v2958_v15 = vld [vmem:[%s5217_s5 + $0x1a8] sm:$0xff] }
 0x246   : > { %3441 = vmatprep.subr.bf16.mxu1 %v3440_v16  ;;  %v2960_v16 = vld [vmem:[%s5217_s5 + $0x1b8] sm:$0xff] }
 0x247   : > { %v3468_v19 = vpack.c.bf16 %v2960_v16, %v2958_v15  ;;  %v3004_v15 = vld [vmem:[%s5217_s5 + $0x2d8] sm:$0xff]  ;;  %v3001_v16 = vld [vmem:[%s5217_s5 + $0x2c0] sm:$0xff] }
 0x303   : > { %v4422_v17 = vpop.f32.mrb[4].mxu1 }
 0x304   : > { %v1339_v20 = vpop.f32.mrb[5].mxu1  ;;  %v1393_v25 = vrot.slane %v4422_v17, 1  ;;  %v1594_v26 = vrot.slane %v4422_v17, 2  ;;  %v1711_v27 = vrot.slane %v4422_v17, 3  ;;  %v1828_v29 = vrot.slane %v4422_v17, 4 }
 0x305   : > { %v2957_v20 = vld [vmem:[%s5217_s5 + $0x1a0] sm:$0xff] }
 0x307   : > { %v4440_v22 = vpop.f32.mrb[6].mxu1 }
 0x308   : > { %v1394_v30 = vrot.slane %v4440_v22, 1  ;;  %v1595_v34 = vrot.slane %v4440_v22, 2  ;;  %v1712_v36 = vrot.slane %v4440_v22, 3  ;;  %v1829_v28 = vrot.slane %v4440_v22, 4  ;;  %v1344_v37 = vpop.f32.mrb[7].mxu1 }
 0x30a   : > { %v1395_v41 = vsel %vm554_vm0, %v1393_v25, %v1394_v30  ;;  %v4462_v44 = vsel %vm766_vm3, %v1594_v26, %v1595_v34  ;;  %v4467_v45 = vsel %vm888_vm4, %v1711_v27, %v1712_v36  ;;  %v4472_v46 = vsel %vm1010_vm2, %v1828_v29, %v1829_v28  ;;  %v2961_v26 = vld [vmem:[%s5217_s5 + $0x1c0] sm:$0xff]  ;;  %v2963_v27 = vld [vmem:[%s5217_s5 + $0x1d0] sm:$0xff]  ;;  %v2966_v29 = vld [vmem:[%s5217_s5 + $0x1e8] sm:$0xff] }
 0x30b   : > { %2943 = vmatmul.mubr.msk.f32.vlgmr.msra.gmra.mrb[8].mxu1 %vm1396_vm9, %v1395_v41  ;;  %v3474_v37 = vpack.c.bf16 %v2963_v27, %v2961_v26  ;;  %v3478_v41 = vpack.c.bf16 %v2967_v40, %v2965_v39  ;;  %v3007_v26 = vld [vmem:[%s5217_s5 + $0x2f0] sm:$0xff]  ;;  %v3010_v27 = vld [vmem:[%s5217_s5 + $0x308] sm:$0xff] }
 0x30c   : > { %3443 = vmatpush1.bf16.msra.mxu1 %v3442_v21  ;;  %1477 = vmatprep.mubr.f32.mxu1 %v3891_v7  ;;  %v2959_v21 = vld [vmem:[%s5217_s5 + $0x1b0] sm:$0xff]  ;;  %v3014_v40 = vld [vmem:[%s5217_s5 + $0x328] sm:$0xff] }
 0x30d   : > { %3445 = vmatprep.subr.bf16.mxu1 %v3444_v38  ;;  %v3470_v24 = vpack.c.bf16 %v2959_v21, %v2957_v20  ;;  %v3008_v20 = vld [vmem:[%s5217_s5 + $0x2f8] sm:$0xff]  ;;  %v2995_v21 = vld [vmem:[%s5217_s5 + $0x2b0] sm:$0xf] }
 0x30e   : > { %v3011_v39 = vld [vmem:[%s5217_s5 + $0x310] sm:$0xff] }
 0x30f   : > { %2944 = vmatmul.mubr.msk.f32.gmra.mrb[10].mxu1 %vm1396_vm9, %v1394_v30  ;;  %v2968_v30 = vld [vmem:[%s5217_s5 + $0x1f8] sm:$0xff] }
 0x310   : > { %3447 = vmatpush1.bf16.msra.mxu1 %v3446_v47  ;;  %1558 = vmatprep.mubr.f32.mxu1 %v3891_v7  ;;  %v3476_v38 = vpack.c.bf16 %v2968_v30, %v2966_v29  ;;  %v2978_v47 = vld [vmem:[%s5217_s5 + $0x228] sm:$0xff]  ;;  %v3012_v29 = vld [vmem:[%s5217_s5 + $0x318] sm:$0xff] }
 0x311   : > { %3449 = vmatprep.subr.bf16.mxu1 %v3448_v48  ;;  %v2975_v48 = vld [vmem:[%s5217_s5 + $0x210] sm:$0xff] }
 0x314   : > { %3451 = vmatpush1.bf16.msra.mxu1 %v3450_v53  ;;  %v3480_v53 = vpack.c.bf16 %v2978_v47, %v2976_v43  ;;  %v3013_v43 = vld [vmem:[%s5217_s5 + $0x320] sm:$0xff]  ;;  %v3015_v47 = vld [vmem:[%s5217_s5 + $0x330] sm:$0xff] }
 0x315   : > { %3453 = vmatprep.subr.bf16.mxu1 %v3452_v54  ;;  %v3482_v54 = vpack.c.bf16 %v2977_v49, %v2975_v48  ;;  %v3018_v48 = vld [vmem:[%s5217_s5 + $0x348] sm:$0xff]  ;;  %v3514_v49 = vpack.c.bf16 %v3015_v47, %v3013_v43  ;;  %v3045_v47 = vld [vmem:[%s5221_s9 + $0xb0] sm:$0xff] }
 0x318   : > { %3455 = vmatpush1.bf16.msra.mxu1 %v3454_v59  ;;  %v2986_v59 = vld [vmem:[%s5217_s5 + $0x268] sm:$0xff] }
 0x319   : > { %3457 = vmatprep.subr.bf16.mxu1 %v3456_v60  ;;  %v3486_v60 = vpack.c.bf16 %v2981_v57, %v2979_v56  ;;  %v3488_v61 = vpack.c.bf16 %v2986_v59, %v2984_v58  ;;  %v1922_v56 = vld [vmem:[%s5218_s6] sm:$0x3] }
 0x31a   : > { %v1927_v57 = vrot.slane %v1922_v56, %v1127_v33  ;;  %v1931_v58 = vrot.slane %v1922_v56, %v1131_v35  ;;  %v3052_v56 = vld [vmem:[%s5221_s9 + $0xe8] sm:$0xff] }
 0x31c   : > { %3459 = vmatpush1.bf16.msra.mxu1 %v3458_v63  ;;  %v2985_v63 = vld [vmem:[%s5217_s5 + $0x260] sm:$0xff] }
 0x31d   : > { %2945 = vmatprep.subr.msk.mxu1 %vm1010_vm2, %v1367_v0  ;;  %v2988_v0 = vld [vmem:[%s5217_s5 + $0x278] sm:$0xff]  ;;  %v3490_v1 = vpack.c.bf16 %v2985_v63, %v2983_v62 }
 0x320   : > { %2946 = vmatpush1.msk.msra.mxu1 %vm1010_vm2, %v1366_v9 }
 0x321   : > { %2947 = vmatmul.mubr.msk.f32.vlgmr.msra.gmra.mrb[8].mxu1 %vm1396_vm9, %v4422_v17  ;;  %3461 = vmatprep.subr.bf16.mxu1 %v3460_v10  ;;  %v2964_v17 = vld [vmem:[%s5217_s5 + $0x1d8] sm:$0xff]  ;;  %v2991_v10 = vld [vmem:[%s5217_s5 + $0x290] sm:$0xff] }
 0x322   : > { %3463 = vmatpush1.bf16.msra.mxu1 %v3462_v11  ;;  %1564 = vmatprep.mubr.f32.mxu1 %v3891_v7  ;;  %v3472_v25 = vpack.c.bf16 %v2964_v17, %v2962_v23  ;;  %v2993_v11 = vld [vmem:[%s5217_s5 + $0x2a0] sm:$0xff]  ;;  %v3500_v23 = vpack.c.bf16 %v3004_v15, %v3002_v14  ;;  %v2032_v14 = vld [vmem:[%s5220_s8 + $0x38] sm:$0xff] }
 0x323   : > { %3465 = vmatprep.subr.bf16.mxu1 %v3464_v12  ;;  %v3498_v12 = vpack.c.bf16 %v2993_v11, %v2991_v10  ;;  %v2029_v10 = vld [vmem:[%s5220_s8 + $0x20] sm:$0xff]  ;;  %v2030_v11 = vld [vmem:[%s5220_s8 + $0x28] sm:$0xff] }
 0x325   : > { %2948 = vmatmul.mubr.msk.f32.gmra.mrb[10].mxu1 %vm1396_vm9, %v4440_v22 }
 0x326   : > { %3467 = vmatpush1.bf16.msra.mxu1 %v3466_v18  ;;  %1671 = vmatprep.mubr.f32.mxu1 %v3891_v7  ;;  %v3003_v18 = vld [vmem:[%s5217_s5 + $0x2d0] sm:$0xff] }
 0x327   : > { %3469 = vmatprep.subr.bf16.mxu1 %v3468_v19  ;;  %v3006_v19 = vld [vmem:[%s5217_s5 + $0x2e8] sm:$0xff]  ;;  %v3502_v17 = vpack.c.bf16 %v3003_v18, %v3001_v16  ;;  %v2033_v16 = vld [vmem:[%s5220_s8 + $0x40] sm:$0xff] }
 0x328   : > { %v2034_v18 = vld [vmem:[%s5220_s8 + $0x48] sm:$0xff] }
 0x32a   : > { %3471 = vmatpush1.bf16.msra.mxu1 %v3470_v24  ;;  %v3504_v24 = vpack.c.bf16 %v3008_v20, %v3006_v19  ;;  %v3539_v19 = vpack.c.bf16 %v2034_v18, %v2033_v16  ;;  %v2035_v20 = vld [vmem:[%s5220_s8 + $0x50] sm:$0xff]  ;;  %v3068_v18 = vld [vmem:[%s5221_s9 + $0x158] sm:$0xff] }
 0x32b   : > { %3473 = vmatprep.subr.bf16.mxu1 %v3472_v25  ;;  %v3005_v25 = vld [vmem:[%s5217_s5 + $0x2e0] sm:$0xff]  ;;  %v3067_v16 = vld [vmem:[%s5221_s9 + $0x150] sm:$0xff] }
 0x32c   : > { %v3506_v30 = vpack.c.bf16 %v3007_v26, %v3005_v25  ;;  %v2039_v26 = vld [vmem:[%s5220_s8 + $0x70] sm:$0xff] }
 0x32e   : > { %3475 = vmatpush1.bf16.msra.mxu1 %v3474_v37  ;;  %v3508_v37 = vpack.c.bf16 %v3012_v29, %v3010_v27  ;;  %v2040_v27 = vld [vmem:[%s5220_s8 + $0x78] sm:$0xff] }
 0x32f   : > { %3477 = vmatprep.subr.bf16.mxu1 %v3476_v38  ;;  %v3009_v38 = vld [vmem:[%s5217_s5 + $0x300] sm:$0xff]  ;;  %v3548_v29 = vpack.c.bf16 %v2040_v27, %v2039_v26 }
 0x332   : > { %3479 = vmatpush1.bf16.msra.mxu1 %v3478_v41  ;;  %v3510_v41 = vpack.c.bf16 %v3011_v39, %v3009_v38  ;;  %v2043_v39 = vld [vmem:[%s5220_s8 + $0x90] sm:$0xff] }
 0x333   : > { %2971 = vmatprep.subr.msk.mxu1 %vm1010_vm2, %v2970_v42 }
 0x336   : > { %2972 = vmatpush1.msk.msra.mxu1 %vm1010_vm2, %v2969_v52  ;;  %v3019_v52 = vld [vmem:[%s5217_s5 + $0x350] sm:$0xff] }
 0x337   : > { %2973 = vmatmul.mubr.msk.f32.vlgmr.msra.gmra.mrb[8].mxu1 %vm1396_vm9, %v4462_v44  ;;  %3481 = vmatprep.subr.bf16.mxu1 %v3480_v53  ;;  %v2990_v44 = vld [vmem:[%s5217_s5 + $0x288] sm:$0xff]  ;;  %v3518_v53 = vpack.c.bf16 %v3019_v52, %v3017_v51  ;;  %v3049_v52 = vld [vmem:[%s5221_s9 + $0xd0] sm:$0xff] }
 0x338   : > { %3483 = vmatpush1.bf16.msra.mxu1 %v3482_v54  ;;  %1677 = vmatprep.mubr.f32.mxu1 %v3891_v7  ;;  %v3492_v2 = vpack.c.bf16 %v2990_v44, %v2988_v0  ;;  %v3022_v54 = vld [vmem:[%s5217_s5 + $0x368] sm:$0xf] }
 0x339   : > { %3485 = vmatprep.subr.bf16.mxu1 %v3484_v55  ;;  %v3021_v55 = vld [vmem:[%s5217_s5 + $0x360] sm:$0xf] }
 0x33b   : > { %2974 = vmatmul.mubr.msk.f32.gmra.mrb[10].mxu1 %vm1396_vm9, %v1595_v34  ;;  %v2994_v34 = vld [vmem:[%s5217_s5 + $0x2a8] sm:$0xff] }
 0x33c   : > { %3487 = vmatpush1.bf16.msra.mxu1 %v3486_v60  ;;  %1788 = vmatprep.mubr.f32.mxu1 %v3891_v7  ;;  %v3496_v9 = vpack.c.bf16 %v2994_v34, %v2992_v6  ;;  %v2027_v34 = vld [vmem:[%s5220_s8 + $0x10] sm:$0xff] }
 0x33d   : > { %3489 = vmatprep.subr.bf16.mxu1 %v3488_v61 }
 0x340   : > { %3491 = vmatpush1.bf16.msra.mxu1 %v3490_v1 }
 0x341   : > { %3493 = vmatprep.subr.bf16.mxu1 %v3492_v2  ;;  %v2025_v2 = vld [vmem:[%s5220_s8] sm:$0xff] }
 0x342   : > { %v3527_v6 = vpack.c.bf16 %v2026_v3, %v2025_v2  ;;  %v3040_v2 = vld [vmem:[%s5221_s9 + $0x98] sm:$0xff] }
 0x344   : > { %3495 = vmatpush1.bf16.msra.mxu1 %v3494_v8  ;;  %v2028_v8 = vld [vmem:[%s5220_s8 + $0x18] sm:$0xff] }
 0x345   : > { %3497 = vmatprep.subr.bf16.mxu1 %v3496_v9  ;;  %v3530_v9 = vpack.c.bf16 %v2028_v8, %v2027_v34  ;;  %v3065_v34 = vld [vmem:[%s5221_s9 + $0x140] sm:$0xff]  ;;  %v3066_v8 = vld [vmem:[%s5221_s9 + $0x148] sm:$0xff] }
 0x348   : > { %3499 = vmatpush1.bf16.msra.mxu1 %v3498_v12  ;;  %v3533_v12 = vpack.c.bf16 %v2030_v11, %v2029_v10  ;;  %v3617_v11 = vpack.c.bf16 %v3066_v8, %v3065_v34  ;;  %v2552_v34 = vld [vmem:[%s5223_s11 + $0x40] sm:$0xff]  ;;  %v2553_v8 = vld [vmem:[%s5223_s11 + $0x48] sm:$0xff] }
 0x349   : > { %2997 = vmatprep.subr.msk.mxu1 %vm1010_vm2, %v2996_v13  ;;  %v2031_v13 = vld [vmem:[%s5220_s8 + $0x30] sm:$0xff] }
 0x34a   : > { %v3536_v15 = vpack.c.bf16 %v2032_v14, %v2031_v13 }
 0x34c   : > { %2998 = vmatpush1.msk.msra.mxu1 %vm1010_vm2, %v2995_v21  ;;  %v2036_v21 = vld [vmem:[%s5220_s8 + $0x58] sm:$0xff] }
 0x34d   : > { %2999 = vmatmul.mubr.msk.f32.vlgmr.msra.gmra.mrb[8].mxu1 %vm1396_vm9, %v4467_v45  ;;  %3501 = vmatprep.subr.bf16.mxu1 %v3500_v23  ;;  %v3016_v45 = vld [vmem:[%s5217_s5 + $0x338] sm:$0xff]  ;;  %v3542_v23 = vpack.c.bf16 %v2036_v21, %v2035_v20  ;;  %v3620_v21 = vpack.c.bf16 %v3068_v18, %v3067_v16  ;;  %v2558_v16 = vld [vmem:[%s5223_s11 + $0x70] sm:$0xff]  ;;  %v2635_v18 = vld [vmem:[%s5225_s13] sm:$0xff] }
 0x34e   : > { %3503 = vmatpush1.bf16.msra.mxu1 %v3502_v17  ;;  %1794 = vmatprep.mubr.f32.mxu1 %v3891_v7  ;;  %v3512_v42 = vpack.c.bf16 %v3016_v45, %v3014_v40  ;;  %v2037_v17 = vld [vmem:[%s5220_s8 + $0x60] sm:$0xff]  ;;  %v2044_v40 = vld [vmem:[%s5220_s8 + $0x98] sm:$0xff] }
 0x34f   : > { %3505 = vmatprep.subr.bf16.mxu1 %v3504_v24  ;;  %v2038_v24 = vld [vmem:[%s5220_s8 + $0x68] sm:$0xff]  ;;  %v3554_v45 = vpack.c.bf16 %v2044_v40, %v2043_v39 }
 0x350   : > { %v3545_v25 = vpack.c.bf16 %v2038_v24, %v2037_v17  ;;  %v2123_v17 = vld [vmem:[%s5221_s9 + $0x28] sm:$0xff]  ;;  %v3069_v24 = vld [vmem:[%s5221_s9 + $0x160] sm:$0xff] }
 0x351   : > { %3000 = vmatmul.mubr.msk.f32.gmra.mrb[10].mxu1 %vm1396_vm9, %v1712_v36  ;;  %v3020_v36 = vld [vmem:[%s5217_s5 + $0x358] sm:$0xff] }
 0x352   : > { %3507 = vmatpush1.bf16.msra.mxu1 %v3506_v30  ;;  %1905 = vmatprep.mubr.f32.mxu1 %v3891_v7  ;;  %v3516_v50 = vpack.c.bf16 %v3020_v36, %v3018_v48  ;;  %v2041_v30 = vld [vmem:[%s5220_s8 + $0x80] sm:$0xff]  ;;  %v3046_v48 = vld [vmem:[%s5221_s9 + $0xb8] sm:$0xff] }
 0x353   : > { %3509 = vmatprep.subr.bf16.mxu1 %v3508_v37  ;;  %v2042_v37 = vld [vmem:[%s5220_s8 + $0x88] sm:$0xff]  ;;  %v3590_v36 = vpack.c.bf16 %v3046_v48, %v3045_v47 }
 0x354   : > { %v3551_v38 = vpack.c.bf16 %v2042_v37, %v2041_v30  ;;  %v2125_v30 = vld [vmem:[%s5221_s9 + $0x38] sm:$0xff]  ;;  %v3071_v37 = vld [vmem:[%s5221_s9 + $0x170] sm:$0xff] }
 0x356   : > { %3511 = vmatpush1.bf16.msra.mxu1 %v3510_v41  ;;  %v3043_v41 = vld [vmem:[%s5221_s9 + $0xa0] sm:$0xff] }
 0x357   : > { %3513 = vmatprep.subr.bf16.mxu1 %v3512_v42  ;;  %v3044_v42 = vld [vmem:[%s5221_s9 + $0xa8] sm:$0xff] }
 0x358   : > { %v3587_v43 = vpack.c.bf16 %v3044_v42, %v3043_v41  ;;  %v2127_v41 = vld [vmem:[%s5221_s9 + $0x48] sm:$0xff]  ;;  %v3073_v42 = vld [vmem:[%s5221_s9 + $0x180] sm:$0xff] }
 0x35a   : > { %3515 = vmatpush1.bf16.msra.mxu1 %v3514_v49  ;;  %v3047_v49 = vld [vmem:[%s5221_s9 + $0xc0] sm:$0xff] }
 0x35b   : > { %3517 = vmatprep.subr.bf16.mxu1 %v3516_v50  ;;  %v3048_v50 = vld [vmem:[%s5221_s9 + $0xc8] sm:$0xff] }
 0x35c   : > { %v3593_v51 = vpack.c.bf16 %v3048_v50, %v3047_v49  ;;  %v3055_v49 = vld [vmem:[%s5221_s9 + $0xf8] sm:$0xff] }
 0x35e   : > { %3519 = vmatpush1.bf16.msra.mxu1 %v3518_v53  ;;  %v3050_v53 = vld [vmem:[%s5221_s9 + $0xd8] sm:$0xff] }
 0x35f   : > { %3023 = vmatprep.subr.msk.mxu1 %vm1010_vm2, %v3022_v54  ;;  %v3596_v54 = vpack.c.bf16 %v3050_v53, %v3049_v52  ;;  %v3056_v52 = vld [vmem:[%s5221_s9 + $0x100] sm:$0xff]  ;;  %v3057_v53 = vld [vmem:[%s5221_s9 + $0x108] sm:$0xff] }
 0x362   : > { %3024 = vmatpush1.msk.msra.mxu1 %vm1010_vm2, %v3021_v55  ;;  %v3051_v55 = vld [vmem:[%s5221_s9 + $0xe0] sm:$0xff] }
 0x363   : > { %3025 = vmatmul.mubr.msk.f32.vlgmr.msra.gmra.mrb[8].mxu1 %vm1396_vm9, %v4472_v46  ;;  %3586 = vmatprep.subr.bf16.mxu1 %v3893_v5 }
 0x364   : > { %1911 = vmatprep.mubr.f32.mxu1 %v3891_v7  ;;  %3588 = vmatpush3.bf16.msra.mxu1 %v3587_v43  ;;  %v3074_v43 = vld [vmem:[%s5221_s9 + $0x188] sm:$0xff] }
 0x365   : > { %3589 = vmatprep.subr.bf16.mxu1 %v3893_v5  ;;  %v3629_v48 = vpack.c.bf16 %v3074_v43, %v3073_v42  ;;  %v2541_v43 = vld [vmem:[%s5222_s10] sm:$0x1] }
 0x367   : > { %3026 = vmatmul.mubr.msk.f32.gmra.mrb[10].mxu1 %vm1396_vm9, %v1829_v28 }
 0x368   : > { %3591 = vmatpush3.bf16.msra.mxu1 %v3590_v36  ;;  %3233 = vmatprep.mubr.msk.f32.mxu1 %vm3894_vm13, %v3891_v7  ;;  %v3054_v36 = vld [vmem:[%s5221_s9 + $0xf0] sm:$0xff] }
 0x369   : > { %3592 = vmatprep.subr.bf16.mxu1 %v3893_v5  ;;  %v3602_v50 = vpack.c.bf16 %v3055_v49, %v3054_v36  ;;  %v2639_v49 = vld [vmem:[%s5225_s13 + $0x20] sm:$0xff] }
 0x36c   : > { %3594 = vmatpush3.bf16.msra.mxu1 %v3593_v51 }
 0x36d   : > { %3595 = vmatprep.subr.bf16.mxu1 %v3893_v5 }
 0x370   : > { %3597 = vmatpush3.bf16.msra.mxu1 %v3596_v54  ;;  %v3605_v54 = vpack.c.bf16 %v3057_v53, %v3056_v52  ;;  %v2641_v52 = vld [vmem:[%s5225_s13 + $0x30] sm:$0xff]  ;;  %v2642_v53 = vld [vmem:[%s5225_s13 + $0x38] sm:$0xff] }
 0x371   : > { %3598 = vmatprep.subr.bf16.mxu1 %v3893_v5 }
 0x436   : > { %v1907_v59 = vpop.f32.mrb[8].mxu1 }
 0x437   : > { %v1934_v46 = vadd.f32 %v1927_v57, %v1907_v59  ;;  %v1909_v60 = vpop.f32.mrb[9].mxu1  ;;  %v3032_v59 = vld [vmem:[%s5221_s9 + $0x58] sm:$0xff] }
 0x438   : > { %v1935_v61 = vadd.f32 %v1931_v58, %v1909_v60 }
 0x439   : > { %3779 = vtanh.f32 %v1934_v46 }
 0x43a   : > { %v1913_v62 = vpop.f32.mrb[10].mxu1  ;;  %3781 = vtanh.f32 %v1935_v61 }
 0x43b   : > { %v1936_v63 = vadd.f32 %v1927_v57, %v1913_v62  ;;  %v1915_v22 = vpop.f32.mrb[11].mxu1  ;;  %v3599_v57 = vpack.c.bf16 %v3052_v56, %v3051_v55  ;;  %v3033_v62 = vld [vmem:[%s5221_s9 + $0x60] sm:$0xff]  ;;  %v3058_v55 = vld [vmem:[%s5221_s9 + $0x110] sm:$0xff]  ;;  %v3059_v56 = vld [vmem:[%s5221_s9 + $0x118] sm:$0xff] }
 0x43c   : > { %v1937_v28 = vadd.f32 %v1931_v58, %v1915_v22  ;;  %v3031_v58 = vld [vmem:[%s5221_s9 + $0x50] sm:$0xff] }
 0x43d   : > { %3783 = vtanh.f32 %v1936_v63  ;;  %3600 = vmatpush3.bf16.msra.mxu1 %v3599_v57  ;;  %v3557_v60 = vpack.c.bf16 %v3032_v59, %v3031_v58  ;;  %v3034_v63 = vld [vmem:[%s5221_s9 + $0x68] sm:$0xff]  ;;  %v3608_v57 = vpack.c.bf16 %v3059_v56, %v3058_v55  ;;  %v3060_v58 = vld [vmem:[%s5221_s9 + $0x120] sm:$0xff] }
 0x43e   : > { %3785 = vtanh.f32 %v1937_v28  ;;  %3616 = vmatprep.subr.bf16.mxu1 %v3893_v5  ;;  %v3560_v22 = vpack.c.bf16 %v3034_v63, %v3033_v62  ;;  %v3035_v28 = vld [vmem:[%s5221_s9 + $0x70] sm:$0xff]  ;;  %v3061_v59 = vld [vmem:[%s5221_s9 + $0x128] sm:$0xff]  ;;  %v2643_v55 = vld [vmem:[%s5225_s13 + $0x40] sm:$0xff] }
 0x43f   : > { %v2644_v56 = vld [vmem:[%s5225_s13 + $0x48] sm:$0xff] }
 0x443   : > { %v3780_v0 = vpop.eup %3779 }
 0x444   : > { %v3782_v44 = vpop.eup %3781 }
 0x447   : > { %v3784_v1 = vpop.eup %3783 }
 0x448   : > { %v3786_v33 = vpop.eup %3785  ;;  %v3523_v32 = vpack.c.bf16 %v3784_v1, %v3780_v0  ;;  %v3036_v0 = vld [vmem:[%s5221_s9 + $0x78] sm:$0xff]  ;;  %v3037_v1 = vld [vmem:[%s5221_s9 + $0x80] sm:$0xff] }
 0x449   : > { %v3520_v35 = vpack.c.bf16 %v3786_v33, %v3782_v44  ;;  %v3563_v44 = vpack.c.bf16 %v3036_v0, %v3035_v28  ;;  %v3038_v33 = vld [vmem:[%s5221_s9 + $0x88] sm:$0xff]  ;;  %v2546_v0 = vld [vmem:[%s5223_s11 + $0x10] sm:$0xff] }
 0x44a   : > { %v2545_v28 = vld [vmem:[%s5223_s11 + $0x8] sm:$0xff] }
 0x44b   : > { %3522 = vmatprep.subr.msk.bf16.mxu0 %vm3521_vm11, %v3520_v35  ;;  %v3039_v35 = vld [vmem:[%s5221_s9 + $0x90] sm:$0xff] }
 0x44c   : > { %3525 = vmatpush1.bf16.msk.msra.mxu0 %vm3521_vm11, %v3523_v32  ;;  %v3566_v32 = vpack.c.bf16 %v3038_v33, %v3037_v1  ;;  %v3569_v3 = vpack.c.bf16 %v3040_v2, %v3039_v35  ;;  %v2547_v1 = vld [vmem:[%s5223_s11 + $0x18] sm:$0xff]  ;;  %v2549_v35 = vld [vmem:[%s5223_s11 + $0x28] sm:$0xff] }
 0x44d   : > { %3526 = vmatprep.subr.bf16.mxu0 %v3893_v5  ;;  %v3635_v33 = vpack.c.bf16 %v2547_v1, %v2546_v0 }
 0x44f   : > { %3029 = vmatmul.mubr.msk.f32.vlgmr.msra.gmra.mrb[8].mxu0 %vm1943_vm12, %v1942_v4  ;;  %v2118_v4 = vld [vmem:[%s5221_s9] sm:$0xff] }
 0x450   : > { %3528 = vmatpush1.bf16.msra.mxu0 %v3527_v6  ;;  %v2119_v6 = vld [vmem:[%s5221_s9 + $0x8] sm:$0xff] }
 0x451   : > { %3529 = vmatprep.subr.bf16.mxu0 %v3893_v5  ;;  %v3572_v10 = vpack.c.bf16 %v2119_v6, %v2118_v4  ;;  %v2551_v4 = vld [vmem:[%s5223_s11 + $0x38] sm:$0xff] }
 0x454   : > { %3531 = vmatpush1.bf16.msra.mxu0 %v3530_v9 }
 0x455   : > { %3532 = vmatprep.subr.bf16.mxu0 %v3893_v5 }
 0x458   : > { %3534 = vmatpush1.bf16.msra.mxu0 %v3533_v12  ;;  %v2120_v12 = vld [vmem:[%s5221_s9 + $0x10] sm:$0xff] }
 0x459   : > { %3535 = vmatprep.subr.bf16.mxu0 %v3893_v5 }
 0x45c   : > { %3537 = vmatpush1.bf16.msra.mxu0 %v3536_v15  ;;  %v2121_v15 = vld [vmem:[%s5221_s9 + $0x18] sm:$0xff] }
 0x45d   : > { %3538 = vmatprep.subr.bf16.mxu0 %v3893_v5  ;;  %v3575_v20 = vpack.c.bf16 %v2121_v15, %v2120_v12 }
 0x460   : > { %3540 = vmatpush1.bf16.msra.mxu0 %v3539_v19 }
 0x461   : > { %3541 = vmatprep.subr.bf16.mxu0 %v3893_v5 }
 0x464   : > { %3543 = vmatpush1.bf16.msra.mxu0 %v3542_v23  ;;  %v2122_v23 = vld [vmem:[%s5221_s9 + $0x20] sm:$0xff] }
 0x465   : > { %3544 = vmatprep.subr.bf16.mxu0 %v3893_v5  ;;  %v3578_v26 = vpack.c.bf16 %v2123_v17, %v2122_v23  ;;  %v2638_v23 = vld [vmem:[%s5225_s13 + $0x18] sm:$0xff] }
 0x468   : > { %3546 = vmatpush1.bf16.msra.mxu0 %v3545_v25  ;;  %v3070_v25 = vld [vmem:[%s5221_s9 + $0x168] sm:$0xff] }
 0x469   : > { %3547 = vmatprep.subr.bf16.mxu0 %v3893_v5  ;;  %v3623_v27 = vpack.c.bf16 %v3070_v25, %v3069_v24 }
 0x46c   : > { %3549 = vmatpush1.bf16.msra.mxu0 %v3548_v29  ;;  %v2124_v29 = vld [vmem:[%s5221_s9 + $0x30] sm:$0xff] }
 0x46d   : > { %3550 = vmatprep.subr.bf16.mxu0 %v3893_v5  ;;  %v3581_v39 = vpack.c.bf16 %v2125_v30, %v2124_v29 }
 0x470   : > { %3552 = vmatpush1.bf16.msra.mxu0 %v3551_v38  ;;  %v3072_v38 = vld [vmem:[%s5221_s9 + $0x178] sm:$0xff] }
 0x471   : > { %3553 = vmatprep.subr.bf16.mxu0 %v3893_v5  ;;  %v3626_v40 = vpack.c.bf16 %v3072_v38, %v3071_v37 }
 0x474   : > { %3555 = vmatpush1.bf16.msra.mxu0 %v3554_v45  ;;  %v2126_v45 = vld [vmem:[%s5221_s9 + $0x40] sm:$0xff] }
 0x475   : > { %3556 = vmatprep.subr.bf16.mxu0 %v3893_v5  ;;  %v3584_v47 = vpack.c.bf16 %v2127_v41, %v2126_v45 }
 0x522   : > { %v2020_v46 = vpop.f32.mrb[8].mxu0 }
 0x523   : > { %v2022_v61 = vpop.f32.mrb[9].mxu0 }
 0x524   : > { %3030 = vmatprep.mubr.msk.f32.mxu0 %vm562_vm1, %v2022_v61  ;;  %v3063_v61 = vld [vmem:[%s5221_s9 + $0x138] sm:$0xff]  ;;  %vm2727_vm1 = vcmask 1040384  }
 0x525   : > { %2113 = vmatmul.mubr.f32.vlgmr.msra.gmra.mrb[10].mxu0 %v2020_v46  ;;  %v3611_v46 = vpack.c.bf16 %v3061_v59, %v3060_v58  ;;  %v2645_v58 = vld [vmem:[%s5225_s13 + $0x50] sm:$0xf]  ;;  %v2559_v59 = vld [vmem:[%s5224_s12] sm:$0x1] }
 0x526   : > { %3558 = vmatpush3.bf16.msra.mxu0 %v3557_v60  ;;  %3187 = vmatprep.mubr.msk.f32.mxu0 %vm3894_vm13, %v3891_v7  ;;  %v3062_v60 = vld [vmem:[%s5221_s9 + $0x130] sm:$0xff] }
 0x527   : > { %3559 = vmatprep.subr.bf16.mxu0 %v3893_v5  ;;  %v3614_v62 = vpack.c.bf16 %v3063_v61, %v3062_v60 }
 0x52a   : > { %3561 = vmatpush3.bf16.msra.mxu0 %v3560_v22  ;;  %v2544_v22 = vld [vmem:[%s5223_s11] sm:$0xff] }
 0x52b   : > { %3562 = vmatprep.subr.bf16.mxu0 %v3893_v5 }
 0x52e   : > { %3564 = vmatpush3.bf16.msra.mxu0 %v3563_v44  ;;  %v3632_v44 = vpack.c.bf16 %v2545_v28, %v2544_v22 }
 0x52f   : > { %3565 = vmatprep.subr.bf16.mxu0 %v3893_v5 }
 0x532   : > { %3567 = vmatpush3.bf16.msra.mxu0 %v3566_v32  ;;  %v2548_v32 = vld [vmem:[%s5223_s11 + $0x20] sm:$0xff] }
 0x533   : > { %3568 = vmatprep.subr.bf16.mxu0 %v3893_v5  ;;  %v3638_v2 = vpack.c.bf16 %v2549_v35, %v2548_v32 }
 0x536   : > { %3570 = vmatpush3.bf16.msra.mxu0 %v3569_v3  ;;  %v2550_v3 = vld [vmem:[%s5223_s11 + $0x30] sm:$0xff] }
 0x537   : > { %3571 = vmatprep.subr.bf16.mxu0 %v3893_v5  ;;  %v3641_v6 = vpack.c.bf16 %v2551_v4, %v2550_v3 }
 0x5f8   : > { %v4916_v9 = vpop.f32.mrb[10].mxu0 }
 0x5f9   : > { %v2140_v13 = vrot.slane %v4916_v9, 1  ;;  %v2297_v14 = vrot.slane %v4916_v9, 2  ;;  %v2116_v19 = vpop.f32.mrb[11].mxu0  ;;  %v2467_v51 = vrot.slane %v4916_v9, 4  ;;  %v2382_v63 = vrot.slane %v4916_v9, 3 }
 0x5fa   : > { %v2636_v19 = vld [vmem:[%s5225_s13 + $0x8] sm:$0xff] }
 0x5fb   : > { %3188 = vmatmul.mubr.msk.f32.vlgmr.msra.gmra.mrb[12].mxu0 %vm2141_vm14, %v2140_v13  ;;  %3234 = vmatmul.mubr.msk.f32.vlgmr.msra.gmra.mrb[12].mxu1 %vm2141_vm14, %v2297_v14  ;;  %v2556_v13 = vld [vmem:[%s5223_s11 + $0x60] sm:$0xff]  ;;  %v2557_v14 = vld [vmem:[%s5223_s11 + $0x68] sm:$0xff] }
 0x5fc   : > { %3573 = vmatpush3.bf16.msra.mxu0 %v3572_v10  ;;  %3618 = vmatpush3.bf16.msra.mxu1 %v3617_v11  ;;  %v2554_v10 = vld [vmem:[%s5223_s11 + $0x50] sm:$0xff]  ;;  %v2555_v11 = vld [vmem:[%s5223_s11 + $0x58] sm:$0xff]  ;;  %v3650_v15 = vpack.c.bf16 %v2557_v14, %v2556_v13 }
 0x5fd   : > { %3574 = vmatprep.subr.bf16.mxu0 %v3893_v5  ;;  %3619 = vmatprep.subr.bf16.mxu1 %v3893_v5  ;;  %v3647_v12 = vpack.c.bf16 %v2555_v11, %v2554_v10 }
 0x5fe   : > { %3210 = vmatprep.mubr.msk.f32.mxu0 %vm3894_vm13, %v3891_v7  ;;  %3279 = vmatprep.mubr.msk.f32.mxu1 %vm3894_vm13, %v3891_v7 }
 0x600   : > { %3576 = vmatpush3.bf16.msra.mxu0 %v3575_v20  ;;  %3621 = vmatpush3.bf16.msra.mxu1 %v3620_v21  ;;  %v2637_v20 = vld [vmem:[%s5225_s13 + $0x10] sm:$0xff]  ;;  %v3653_v21 = vpack.c.bf16 %v2636_v19, %v2635_v18 }
 0x601   : > { %3577 = vmatprep.subr.bf16.mxu0 %v3893_v5  ;;  %3622 = vmatprep.subr.bf16.mxu1 %v3893_v5  ;;  %v3656_v17 = vpack.c.bf16 %v2638_v23, %v2637_v20 }
 0x604   : > { %3579 = vmatpush3.bf16.msra.mxu0 %v3578_v26  ;;  %3624 = vmatpush3.bf16.msra.mxu1 %v3623_v27 }
 0x605   : > { %3580 = vmatprep.subr.bf16.mxu0 %v3893_v5  ;;  %3625 = vmatprep.subr.bf16.mxu1 %v3893_v5 }
 0x608   : > { %3582 = vmatpush3.bf16.msra.mxu0 %v3581_v39  ;;  %3627 = vmatpush3.bf16.msra.mxu1 %v3626_v40 }
 0x609   : > { %3583 = vmatprep.subr.bf16.mxu0 %v3893_v5  ;;  %3628 = vmatprep.subr.bf16.mxu1 %v3893_v5 }
 0x60c   : > { %3585 = vmatpush3.bf16.msra.mxu0 %v3584_v47  ;;  %3630 = vmatpush3.bf16.msra.mxu1 %v3629_v48 }
 0x60d   : > { %3601 = vmatprep.subr.bf16.mxu0 %v3893_v5  ;;  %3652 = vmatprep.subr.bf16.mxu1 %v3893_v5 }
 0x60f   : > { %3211 = vmatmul.mubr.msk.f32.vlgmr.msra.gmra.mrb[14].mxu0 %vm2141_vm14, %v4916_v9  ;;  %3280 = vmatmul.mubr.msk.f32.vlgmr.msra.gmra.mrb[14].mxu1 %vm2141_vm14, %v2467_v51  ;;  %v3644_v9 = vpack.c.bf16 %v2553_v8, %v2552_v34 }
 0x610   : > { %3603 = vmatpush3.bf16.msra.mxu0 %v3602_v50  ;;  %3256 = vmatprep.mubr.msk.f32.mxu0 %vm3894_vm13, %v3891_v7  ;;  %v2640_v50 = vld [vmem:[%s5225_s13 + $0x28] sm:$0xff] }
 0x611   : > { %3604 = vmatprep.subr.bf16.mxu0 %v3893_v5  ;;  %3337 = vmatprep.mubr.msk.f32.mxu1 %vm3894_vm13, %v3891_v7  ;;  %v3659_v51 = vpack.c.bf16 %v2640_v50, %v2639_v49 }
 0x612   : > { %3654 = vmatpush3.bf16.msra.mxu1 %v3653_v21 }
 0x613   : > { %3655 = vmatprep.subr.bf16.mxu1 %v3893_v5 }
 0x614   : > { %3606 = vmatpush3.bf16.msra.mxu0 %v3605_v54  ;;  %v3662_v54 = vpack.c.bf16 %v2642_v53, %v2641_v52 }
 0x615   : > { %3607 = vmatprep.subr.bf16.mxu0 %v3893_v5 }
 0x616   : > { %3657 = vmatpush3.bf16.msra.mxu1 %v3656_v17 }
 0x617   : > { %3658 = vmatprep.subr.bf16.mxu1 %v3893_v5 }
 0x618   : > { %3609 = vmatpush3.bf16.msra.mxu0 %v3608_v57  ;;  %v3665_v57 = vpack.c.bf16 %v2644_v56, %v2643_v55 }
 0x619   : > { %3610 = vmatprep.subr.bf16.mxu0 %v3893_v5 }
 0x61a   : > { %3660 = vmatpush3.bf16.msra.mxu1 %v3659_v51 }
 0x61b   : > { %3661 = vmatprep.subr.bf16.mxu1 %v3893_v5 }
 0x61c   : > { %3612 = vmatpush3.bf16.msra.mxu0 %v3611_v46 }
 0x61d   : > { %3613 = vmatprep.subr.bf16.mxu0 %v3893_v5 }
 0x61e   : > { %3663 = vmatpush3.bf16.msra.mxu1 %v3662_v54 }
 0x61f   : > { %3664 = vmatprep.subr.bf16.mxu1 %v3893_v5 }
 0x620   : > { %3615 = vmatpush3.bf16.msra.mxu0 %v3614_v62 }
 0x621   : > { %3631 = vmatprep.subr.bf16.mxu0 %v3893_v5 }
 0x622   : > { %3666 = vmatpush3.bf16.msra.mxu1 %v3665_v57 }
 0x623   : > { %3257 = vmatmul.mubr.msk.f32.vlgmr.msra.gmra.mrb[16].mxu0 %vm2141_vm14, %v2382_v63  ;;  %3335 = vmatprep.subr.mxu1 %v3891_v7 }
 0x624   : > { %3312 = vmatprep.mubr.msk.f32.mxu0 %vm3894_vm13, %v3891_v7  ;;  %3633 = vmatpush3.bf16.msra.mxu0 %v3632_v44 }
 0x625   : > { %3634 = vmatprep.subr.bf16.mxu0 %v3893_v5 }
 0x626   : > { %3336 = vmatpush3.msk.msra.mxu1 %vm1010_vm2, %v2645_v58 }
 0x628   : > { %3636 = vmatpush3.bf16.msra.mxu0 %v3635_v33 }
 0x629   : > { %3637 = vmatprep.subr.bf16.mxu0 %v3893_v5 }
 0x62c   : > { %3639 = vmatpush3.bf16.msra.mxu0 %v3638_v2 }
 0x62d   : > { %3640 = vmatprep.subr.bf16.mxu0 %v3893_v5 }
 0x630   : > { %3642 = vmatpush3.bf16.msra.mxu0 %v3641_v6 }
 0x631   : > { %3643 = vmatprep.subr.bf16.mxu0 %v3893_v5 }
 0x634   : > { %3645 = vmatpush3.bf16.msra.mxu0 %v3644_v9 }
 0x635   : > { %3646 = vmatprep.subr.bf16.mxu0 %v3893_v5 }
 0x638   : > { %3648 = vmatpush3.bf16.msra.mxu0 %v3647_v12 }
 0x639   : > { %3649 = vmatprep.subr.bf16.mxu0 %v3893_v5  ;;  %v2724_v5 = vand.u32 127, %v1125_v31 }
 0x63b   : > { %vm2725_vm0 = vcmp.lt.s32.totalorder %v2724_v5, 10 }
 0x63c   : > { %3651 = vmatpush3.bf16.msra.mxu0 %v3650_v15 }
 0x63d   : > { %3310 = vmatprep.subr.mxu0 %v3891_v7  ;;  %v2646_v7 = vld [vmem:[%s5226_s14] sm:$0x1] }
 0x640   : > { %3311 = vmatpush3.msra.mxu0 %v2558_v16 }
 0x6ce   : > { %v2210_v24 = vpop.f32.mrb[12].mxu0  ;;  %v2366_v25 = vpop.f32.mrb[12].mxu1 }
 0x6cf   : > { %v3189_v26 = vpop.f32.mrb[13].mxu0  ;;  %v3235_v27 = vpop.f32.mrb[13].mxu1 }
 0x6e2   : > { %v2282_v29 = vpop.f32.mrb[14].mxu0  ;;  %v2536_v30 = vpop.f32.mrb[14].mxu1 }
 0x6e3   : > { %v2283_v37 = vadd.f32 %v2282_v29, %v2210_v24  ;;  %v3212_v38 = vpop.f32.mrb[15].mxu0  ;;  %v3281_v39 = vpop.f32.mrb[15].mxu1 }
 0x6e5   : > { %v2370_v40 = vadd.f32 %v2366_v25, %v2283_v37 }
 0x6f6   : > { %v2451_v45 = vpop.f32.mrb[16].mxu0 }
 0x6f7   : > { %v2455_v41 = vadd.f32 %v2451_v45, %v2370_v40  ;;  %v3258_v42 = vpop.f32.mrb[17].mxu0 }
 0x6f9   : > { %v2540_v47 = vadd.f32 %v2536_v30, %v2455_v41 }
 0x6fb   : > { %v2542_v48 = vadd.f32 %v2541_v43, %v2540_v47 }
 0x6fd   : > { %3787 = vtanh.f32 %v2542_v48 }
 0x707   : > { %v3788_v36 = vpop.eup %3787 }
 0x708   : > { %3313 = vmatmul.mubr.msk.f32.vlgmr.msra.gmra.mrb[18].mxu0 %vm2560_vm15, %v3788_v36 }
 0x7db   : > { %v2630_v46 = vpop.f32.mrb[18].mxu0 }
 0x7dc   : > { %v2631_v60 = vadd.f32 %v2630_v46, %v2559_v59  ;;  %v3314_v61 = vpop.f32.mrb[19].mxu0 }
 0x7de   : > { %3789 = vtanh.f32 %v2631_v60 }
 0x7e8   : > { %v3790_v62 = vpop.eup %3789 }
 0x7e9   : > { %3338 = vmatmul.mubr.msk.f32.vlgmr.msra.gmra.mrb[16].mxu1 %vm1396_vm9, %v3790_v62 }
 0x8bc   : > { %v2719_v63 = vpop.f32.mrb[16].mxu1 }
 0x8bd   : > { %v2720_v22 = vadd.f32 %v2719_v63, %v2646_v7  ;;  %v3339_v28 = vpop.f32.mrb[17].mxu1 }
 0x8bf   : > { %v2726_v0 = vsel %vm2725_vm0, %v2720_v22, -1e+30  ;;  %v2739_v44 = vsel %vm2725_vm0, %v2720_v22, 0.0 }
 0x8c0   : > { %v2728_v1 = vsel %vm2727_vm1, %v2726_v0, -inf  ;;  %2740 = vst [vmem:[%s517_s20] sm:$0x1] %v2739_v44 }
 0x8c1   : > { %2729 = vmax.xlane.f32.xlu0 %v2728_v1 }
 0x94e   : > { %v2730_v31 = vpop.xlane.xlu0 %2729 }
 0x94f   : > { %v2731_v33 = vsub.f32 %v2726_v0, %v2730_v31 }
 0x951   : > { %v2732_v32 = vmul.f32 1.442695, %v2731_v33 }
 0x953   : > { %3791 = vpow2.f32 %v2732_v32 }
 0x95d   : > { %v3792_v35 = vpop.eup %3791 }
 0x95e   : > { %v2734_v2 = vsel %vm2727_vm1, %v3792_v35, 0.0 }
 0x95f   : > { %2735 = vadd.xlane.f32.xlu0 %v2734_v2 }
 0x960   : > { %3808 = shalt.err (!%p3805_p3)
}
 0x961   : > { %s3809_s21 = scalar_lea.hbm %s5143_s17, 16  ;;  %s3813_s30 = scalar_lea.hbm %s5227_s15, 32 }
 0x962   : > { %p3810_p4 = scmp.ne.s32.totalorder %s5143_s17, %s3809_s21  ;;  %p3814_p9 = scmp.lt.u32.totalorder %s5143_s17, %s5227_s15 }
 0x963   : > { %p3815_p10 = scmp.lt.u32.totalorder %s3813_s30, %s3809_s21  ;;  %p3817_p12 = scmp.lt.u32.totalorder %s3809_s21, %s5143_s17 }
 0x964   : > { %p3811_p7 = pnand %p3810_p4, %p4020_p5 }
 0x965   : > { %p3816_p11 = por %p3815_p10, %p3814_p9 }
 0x966   : > { %p3812_p8 = pneg %p3811_p7 }
 0x967   : > { %p3818_p13 = por %p3817_p12, %p3816_p11 }
 0x969   : > { %p3819_p0 = pnand %p3818_p13, %p3812_p8 }
 0x96b   : > { %3822 = shalt.err (!%p3819_p0)
}
 0x96c   : > { %3715 = dma.vmem_to_hbm [thread:$0]  (%p4020_p5), %s2760_s24, 16, %s5143_s17, %s2743_s28  }
 0x96d   : > { %s523_s29 = scalar_lea.vmem [#allocation4], %s5134_s19  ;;  %s5247_s23 = sld [smem:[#allocation15_spill]] }
 0x96e   : > { %s2772_s16 = sshll.u32 %s523_s29, 4  ;;  %s2747_s27 = scalar_lea.sflag [#allocation5], %s5134_s19  ;;  %s5171_s16 = int_to_ptr.vmem [resolvable:$true] %s2772_s16 }
 0x96f   : > { %s3823_s17 = scalar_lea.vmem %s5171_s16, 16  ;;  %s3896_s24 = smov [#allocation4]  }
 0x970   : > { %p3824_p1 = scmp.ne.s32.totalorder %s5171_s16, %s3823_s17  ;;  %s3827_s28 = sshll.u32 %s3896_s24, 4  ;;  %s3828_s28 = int_to_ptr.vmem [resolvable:$false] %s3827_s28 }
 0x971   : > { %s3829_s25 = scalar_lea.vmem %s3828_s28, 32  ;;  %p3830_p4 = scmp.lt.s32.totalorder %s5171_s16, %s3828_s28 }
 0x972   : > { %p3825_p2 = pnand %p3824_p1, %p4020_p5  ;;  %p3831_p7 = scmp.lt.s32.totalorder %s3829_s25, %s3823_s17 }
 0x973   : > { %s5248_s30 = smov %s5247_s23  ;;  %s5169_s18 = scalar_lea.hbm %s5247_s23, %s3079_s26 }
 0x974   : > { %p3826_p3 = pneg %p3825_p2  ;;  %p3832_p8 = por %p3831_p7, %p3830_p4 }
 0x976   : > { %p3833_p9 = pnand %p3832_p8, %p3826_p3 }
 0x9ec   : > { %v2736_v3 = vpop.xlane.xlu0 %2735 }
 0x9ed   : > { %3793 = vrcp.f32 %v2736_v3 }
 0x9f7   : > { %v3794_v4 = vpop.eup %3793 }
 0x9f8   : > { %v2738_v6 = vmul.f32 %v3794_v4, %v3792_v35 }
 0x9fa   : > { %2741 = vst [vmem:[%s523_s29] sm:$0x1] %v2738_v6 }
 0x9fb   : > { %3836 = shalt.err (!%p3833_p9)
}
 0x9fc   : > { %s3837_s19 = scalar_lea.hbm %s5169_s18, 16  ;;  %s3841_s20 = scalar_lea.hbm %s5248_s30, 32 }
 0x9fd   : > { %p3838_p10 = scmp.ne.s32.totalorder %s5169_s18, %s3837_s19  ;;  %p3842_p13 = scmp.lt.u32.totalorder %s5169_s18, %s5248_s30 }
 0x9fe   : > { %p3843_p0 = scmp.lt.u32.totalorder %s3841_s20, %s3837_s19  ;;  %p3845_p2 = scmp.lt.u32.totalorder %s3837_s19, %s5169_s18 }
 0x9ff   : > { %p3839_p11 = pnand %p3838_p10, %p4020_p5 }
 0xa00   : > { %p3844_p1 = por %p3843_p0, %p3842_p13 }
 0xa01   : > { %p3840_p12 = pneg %p3839_p11 }
 0xa02   : > { %p3846_p3 = por %p3845_p2, %p3844_p1 }
 0xa04   : > { %p3847_p4 = pnand %p3846_p3, %p3840_p12 }
 0xa06   : > { %3850 = shalt.err (!%p3847_p4)
}
 0xa07   : > { %3716 = dma.vmem_to_hbm [thread:$0]  (%p4020_p5), %s5171_s16, 16, %s5169_s18, %s2747_s27  }
 0xa08 PF: > { %s5249_s17 = sld [smem:[#allocation10_spill]]  ;;  %s5250_s24 = sld [smem:[#allocation8_spill]] }
 0xa0e   : > { %p3726_p7 = scmp.ge.s32.totalorder %s5249_s17, 2  ;;  %s2784_s25 = sand.u32 1, %s5250_s24  }
 0xa0f   : > { %s2785_s26 = scalar_lea.sflag [#allocation3], %s2784_s25 }
 0xa10   : > { %p3720_p8 = pnand %p3726_p7, %p4024_p6 }
 0xa12   : > { %3868 = dma.done.wait (!%p3720_p8), %s2785_s26, 16  }
 0xa13   : > { %3870 = vsyncadd (!%p3720_p8), %s2785_s26, 4294967280  ;;  %s2793_s19 = scalar_lea.sflag [#allocation5], %s2784_s25 }
 0xa14   : > { %3872 = dma.done.wait (!%p3720_p8), %s2793_s19, 16  }
 0xa15   : > { %3874 = vsyncadd (!%p3720_p8), %s2793_s19, 4294967280  ;;  %s5252_s24 = sld [smem:[#allocation11_spill]]  ;;  %s5253_s0 = sld [smem:[#allocation9_spill]] }
 0xa16   : > { %s5254_s23 = sld [smem:[#allocation12_spill]]  ;;  %s5255_s21 = smov %s3881_s22 }
 0xa1b   : > { %p30_p5 = scmp.ge.s32.totalorder %s5252_s24, 4   ;;  %s5256_s22 = smov %s5253_s0 }
 0xa1d   :  { %32 = sbr.rel (!%p30_p5) target bundleno = 8 (0x8), region = 144 }
 0xa24   :  { %2797 = vsyncpa [#allocation3], 1 }
 0xa25   :  { %2799 = vsyncpa [#allocation3 + $0x1], 1 }
 0xa26   :  { %2800 = vsyncpa [#allocation5], 1 }
 0xa27   :  { %2802 = vsyncpa [#allocation5 + $0x1], 1 }

</bundles_post_ra>
